<compile_context>
chip_gen: v7x
topology: tpu7x:2x2x1
jax: 0.10.0
libtpu: 0.0.40
codegen_flags: <defaults>
</compile_context>

<pallas_src>
import functools

import jax
import jax.numpy as jnp
from jax.experimental import pallas as pl
from jax.experimental.pallas import tpu as pltpu


def _downsample_unstack_kernel(x_ref, o_ref, *, stride, h_blk, w_out, c_blk):
    # x_ref block: (c_blk, h_blk*s, W)            -- c_blk input (n, c) plane slabs
    # o_ref block: (c_blk, s*s, h_blk*w_out)      -- lane-dense flattened output
    s2 = stride * stride
    hw = h_blk * w_out
    for c in range(c_blk):  # static unroll; c_blk is capped small
        xc = x_ref[c]                                   # (h_blk*s, W)
        y = xc.reshape(h_blk, stride, w_out, stride)    # (h, i, w, j)
        y = jnp.transpose(y, (1, 3, 0, 2))              # (i, j, h, w)
        o_ref[c] = y.reshape(s2, hw)                    # lane-dense rows


_MAX_UNROLL = 32
# Per-block byte cap: in + out blocks, each double-buffered -> ~4x this resident.
_BLOCK_CAP_BYTES = 6 * 1024 * 1024


def _largest_divisor_leq(n, limit):
    limit = max(1, min(n, limit))
    for d in range(limit, 0, -1):
        if n % d == 0:
            return d
    return 1


def _pick_tiling(n_planes, h_out, w_out, stride, itemsize):
    """Choose (c_blk, h_blk): planes per block and h_out rows per block."""
    w_in = w_out * stride
    plane_bytes = h_out * stride * w_in * itemsize

    if plane_bytes <= _BLOCK_CAP_BYTES:
        # Whole planes fit: batch as many planes as the budget / unroll cap allows.
        h_blk = h_out
        cap = min(_MAX_UNROLL, max(1, _BLOCK_CAP_BYTES // plane_bytes))
        c_blk = _largest_divisor_leq(n_planes, cap)
        # Prefer >= 2 grid steps so the parallel axis can split across the two
        # TensorCores on v7x (neutral on v5e/v6e). Only matters for tiny inputs.
        if c_blk == n_planes and n_planes > 1:
            c_blk = _largest_divisor_leq(n_planes, max(1, n_planes // 2))
        return c_blk, h_blk

    # Single plane exceeds the block budget: keep c_blk = 1 and tile along h_out.
    c_blk = 1
    sublane = 8 * max(1, 4 // itemsize)       # 8 (f32), 16 (bf16), 32 (int8/fp8)
    row_bytes = stride * w_in * itemsize      # input bytes per h_out row
    cap_rows = max(1, _BLOCK_CAP_BYTES // row_bytes)
    h_blk = h_out                             # fallback: whole plane (old behavior)
    for cand in range(min(h_out - 1, cap_rows), 0, -1):
        if h_out % cand:
            continue
        if (cand * stride) % sublane:         # input block sublane tiling
            continue
        if (cand * w_out) % 128:              # output block lane tiling
            continue
        h_blk = cand
        break
    return c_blk, h_blk


def downsample_unstack(x, stride):
    N, C, H, W = x.shape
    if stride <= 0:
        raise ValueError("stride must be positive")
    if H % stride or W % stride:
        raise ValueError("H and W must be divisible by stride")
    if stride == 1:
        return x  # identity: (N, C*1, H, W)

    h_out, w_out = H // stride, W // stride
    s2 = stride * stride
    hw = h_out * w_out

    n_planes = N * C
    itemsize = x.dtype.itemsize
    c_blk, h_blk = _pick_tiling(n_planes, h_out, w_out, stride, itemsize)
    plane_steps = n_planes // c_blk
    h_steps = h_out // h_blk
    grid = (plane_steps, h_steps)   # h axis fastest -> contiguous HBM sweep

    # Free (contiguous) reshape: collapse (N, C) into one plane axis.
    x_flat = x.reshape(n_planes, H, W)

    kernel = functools.partial(
        _downsample_unstack_kernel,
        stride=stride, h_blk=h_blk, w_out=w_out, c_blk=c_blk)

    out_flat = pl.pallas_call(
        kernel,
        out_shape=jax.ShapeDtypeStruct((n_planes, s2, hw), x.dtype),
        grid=grid,
        in_specs=[pl.BlockSpec((c_blk, h_blk * stride, W),
                               lambda p, hb: (p, hb, 0))],
        out_specs=pl.BlockSpec((c_blk, s2, h_blk * w_out),
                               lambda p, hb: (p, 0, hb)),
        compiler_params=pltpu.CompilerParams(
            dimension_semantics=("parallel", "parallel"),
            vmem_limit_bytes=48 * 1024 * 1024),
        cost_estimate=pl.CostEstimate(
            flops=0,
            transcendentals=0,
            bytes_accessed=2 * x.size * itemsize),
    )(x_flat)

    # (N*C, s*s, h_out*w_out) and (N, C*s*s, h_out, w_out) have identical
    # contiguous memory order, so this reshape is free.
    return out_flat.reshape(N, C * s2, h_out, w_out)


def _reference(x, stride):
    N, C, H, W = x.shape
    y = x.reshape(N, C, H // stride, stride, W // stride, stride)
    y = jnp.transpose(y, (0, 1, 3, 5, 2, 4))
    return y.reshape(N, C * stride * stride, H // stride, W // stride)


if __name__ == "__main__":
    key = jax.random.PRNGKey(0)
    N, C, H, W = 2, 4, 16, 16
    stride = 2
    x = jax.random.normal(key, (N, C, H, W), dtype=jnp.float32)

    out = jax.block_until_ready(downsample_unstack(x, stride))

    ref = _reference(x, stride)
    assert out.shape == ref.shape, (out.shape, ref.shape)
    assert jnp.array_equal(out, ref), "mismatch vs reference"
    print("KERNEL_OK")
</pallas_src>

<mosaic_0001>
module attributes {stable_mosaic.version = 11 : i64} {
  func.func @_downsample_unstack_kernel(%arg0: i32, %arg1: i32, %arg2: memref<4x16x16xf32, #tpu.memory_space<vmem>>, %arg3: memref<4x4x64xf32, #tpu.memory_space<vmem>>) attributes {dimension_semantics = [#tpu.dimension_semantics<parallel>, #tpu.dimension_semantics<parallel>], iteration_bounds = array<i64: 2, 1>, scalar_prefetch = 0 : i64, scratch_operands = 0 : i64, tpu.core_type = #tpu.core_type<tc>, window_params = [{transform_indices = @transform_0, window_bounds = array<i64: 4, 16, 16>}, {transform_indices = @transform_1, window_bounds = array<i64: 4, 4, 64>}]} {
    %c0 = arith.constant 0 : index
    %c0_0 = arith.constant 0 : index
    %c0_1 = arith.constant 0 : index
    %0 = vector.load %arg2[%c0, %c0_0, %c0_1] : memref<4x16x16xf32, #tpu.memory_space<vmem>>, vector<1x16x16xf32>
    %1 = vector.shape_cast %0 : vector<1x16x16xf32> to vector<16x16xf32>
    %2 = vector.shape_cast %1 : vector<16x16xf32> to vector<8x2x8x2xf32>
    %3 = tpu.transpose %2, [1, 3, 0, 2] : vector<8x2x8x2xf32> -> vector<2x2x8x8xf32>
    %4 = vector.shape_cast %3 : vector<2x2x8x8xf32> to vector<4x64xf32>
    %c0_2 = arith.constant 0 : index
    %c0_3 = arith.constant 0 : index
    %c0_4 = arith.constant 0 : index
    %5 = vector.load %arg3[%c0_2, %c0_3, %c0_4] : memref<4x4x64xf32, #tpu.memory_space<vmem>>, vector<1x4x64xf32>
    %6 = vector.shape_cast %5 : vector<1x4x64xf32> to vector<4x64xf32>
    %7 = vector.shape_cast %4 : vector<4x64xf32> to vector<1x4x64xf32>
    tpu.vector_store %arg3[%c0_2, %c0_3, %c0_4], %7 {strides = array<i32>} : memref<4x4x64xf32, #tpu.memory_space<vmem>>, vector<1x4x64xf32>,
    %c1 = arith.constant 1 : index
    %c0_5 = arith.constant 0 : index
    %c0_6 = arith.constant 0 : index
    %8 = vector.load %arg2[%c1, %c0_5, %c0_6] : memref<4x16x16xf32, #tpu.memory_space<vmem>>, vector<1x16x16xf32>
    %9 = vector.shape_cast %8 : vector<1x16x16xf32> to vector<16x16xf32>
    %10 = vector.shape_cast %9 : vector<16x16xf32> to vector<8x2x8x2xf32>
    %11 = tpu.transpose %10, [1, 3, 0, 2] : vector<8x2x8x2xf32> -> vector<2x2x8x8xf32>
    %12 = vector.shape_cast %11 : vector<2x2x8x8xf32> to vector<4x64xf32>
    %c1_7 = arith.constant 1 : index
    %c0_8 = arith.constant 0 : index
    %c0_9 = arith.constant 0 : index
    %13 = vector.load %arg3[%c1_7, %c0_8, %c0_9] : memref<4x4x64xf32, #tpu.memory_space<vmem>>, vector<1x4x64xf32>
    %14 = vector.shape_cast %13 : vector<1x4x64xf32> to vector<4x64xf32>
    %15 = vector.shape_cast %12 : vector<4x64xf32> to vector<1x4x64xf32>
    tpu.vector_store %arg3[%c1_7, %c0_8, %c0_9], %15 {strides = array<i32>} : memref<4x4x64xf32, #tpu.memory_space<vmem>>, vector<1x4x64xf32>,
    %c2 = arith.constant 2 : index
    %c0_10 = arith.constant 0 : index
    %c0_11 = arith.constant 0 : index
    %16 = vector.load %arg2[%c2, %c0_10, %c0_11] : memref<4x16x16xf32, #tpu.memory_space<vmem>>, vector<1x16x16xf32>
    %17 = vector.shape_cast %16 : vector<1x16x16xf32> to vector<16x16xf32>
    %18 = vector.shape_cast %17 : vector<16x16xf32> to vector<8x2x8x2xf32>
    %19 = tpu.transpose %18, [1, 3, 0, 2] : vector<8x2x8x2xf32> -> vector<2x2x8x8xf32>
    %20 = vector.shape_cast %19 : vector<2x2x8x8xf32> to vector<4x64xf32>
    %c2_12 = arith.constant 2 : index
    %c0_13 = arith.constant 0 : index
    %c0_14 = arith.constant 0 : index
    %21 = vector.load %arg3[%c2_12, %c0_13, %c0_14] : memref<4x4x64xf32, #tpu.memory_space<vmem>>, vector<1x4x64xf32>
    %22 = vector.shape_cast %21 : vector<1x4x64xf32> to vector<4x64xf32>
    %23 = vector.shape_cast %20 : vector<4x64xf32> to vector<1x4x64xf32>
    tpu.vector_store %arg3[%c2_12, %c0_13, %c0_14], %23 {strides = array<i32>} : memref<4x4x64xf32, #tpu.memory_space<vmem>>, vector<1x4x64xf32>,
    %c3 = arith.constant 3 : index
    %c0_15 = arith.constant 0 : index
    %c0_16 = arith.constant 0 : index
    %24 = vector.load %arg2[%c3, %c0_15, %c0_16] : memref<4x16x16xf32, #tpu.memory_space<vmem>>, vector<1x16x16xf32>
    %25 = vector.shape_cast %24 : vector<1x16x16xf32> to vector<16x16xf32>
    %26 = vector.shape_cast %25 : vector<16x16xf32> to vector<8x2x8x2xf32>
    %27 = tpu.transpose %26, [1, 3, 0, 2] : vector<8x2x8x2xf32> -> vector<2x2x8x8xf32>
    %28 = vector.shape_cast %27 : vector<2x2x8x8xf32> to vector<4x64xf32>
    %c3_17 = arith.constant 3 : index
    %c0_18 = arith.constant 0 : index
    %c0_19 = arith.constant 0 : index
    %29 = vector.load %arg3[%c3_17, %c0_18, %c0_19] : memref<4x4x64xf32, #tpu.memory_space<vmem>>, vector<1x4x64xf32>
    %30 = vector.shape_cast %29 : vector<1x4x64xf32> to vector<4x64xf32>
    %31 = vector.shape_cast %28 : vector<4x64xf32> to vector<1x4x64xf32>
    tpu.vector_store %arg3[%c3_17, %c0_18, %c0_19], %31 {strides = array<i32>} : memref<4x4x64xf32, #tpu.memory_space<vmem>>, vector<1x4x64xf32>,
    return
  }
  func.func @transform_0(%arg0: i32, %arg1: i32) -> (i32, i32, i32) {
    %c0_i32 = arith.constant 0 : i32
    %c0_i32_0 = arith.constant 0 : i32
    return %arg0, %arg1, %c0_i32 : i32, i32, i32
  }
  func.func @transform_1(%arg0: i32, %arg1: i32) -> (i32, i32, i32) {
    %c0_i32 = arith.constant 0 : i32
    %c0_i32_0 = arith.constant 0 : i32
    return %arg0, %c0_i32, %arg1 : i32, i32, i32
  }
}

</mosaic_0001>

<bundles_post_ra>
// kernel: tpu_custom_call.1
= control target key start
LH: loop header
LB: loop body
LE: loop exit
PB: predicated region body
PF: predicated region fallthrough
CT: control target
= control target key end

     0   :  { %6 = vsyncpa [#allocation3], 0  ;;  %s5491_s0 = inlined_call_operand.hbm [shape: f32[8,16,16], index: 0, kind: input, shape index: {}]   ;;  %s5492_s1 = inlined_call_operand.hbm [shape: f32[8,4,64], index: 1, kind: output, shape index: {}]  }
   0x1   :  { %8 = vsyncpa [#allocation3 + $0x1], 0 }
   0x2   :  { %9 = vsyncpa [#allocation4], 0 }
   0x3   :  { %11 = vsyncpa [#allocation4 + $0x1], 0  ;;  %s4682_s6 = smov 0   ;;  %s4684_s7 = smov 0  }
   0x4   :  { %s4686_s8 = smov 0   ;;  %s4688_s9 = smov 0  }
   0x5   :  { %s4690_s10 = smov 0   ;;  %s4692_s11 = smov 0  }
   0x6 LB: > { %s4408_s12 = sadd.s32 4294967295, %s4647_s11   ;;  %s4409_s13 = sadd.s32 4294967294, %s4647_s11   ;;  %s4647_s11 = sphi %s4692_s11, %s17_s11   ;;  %s4643_s10 = sphi %s4690_s10, %s5507_s10   ;;  %s4639_s9 = sphi %s4688_s9, %s5506_s9   ;;  %s4635_s8 = sphi %s4686_s8, %s5505_s8   ;;  %s4631_s7 = sphi %s4684_s7, %s5504_s7   ;;  %s4627_s6 = sphi %s4682_s6, %s5503_s6  }
   0x7   : > { %s29_s14 = sadd.s32 1, %s4643_s10  ;;  %s38_s15 = sadd.s32 1, %s4635_s8 }
   0x8   : > { %p31_p0 = scmp.ge.s32.totalorder %s29_s14, 2  ;;  %p45_p1 = scmp.ne.s32.totalorder %s4635_s8, %s4631_s7 }
   0x9   : > { %p46_p2 = scmp.eq.s32.totalorder %s4647_s11, 0  ;;  %p51_p3 = scmp.ne.s32.totalorder %s4631_s7, %s4627_s6 }
   0xa   : > { %s5509_s14 = smov (%p31_p0, %s29_s14), 0  ;;  %p52_p5 = scmp.eq.s32.totalorder %s4408_s12, 0 }
   0xb   : > { %p4723_p4 = por %p46_p2, %p45_p1  ;;  %s33_s17 = ssub.s32 %s4643_s10, %s5509_s14 }
   0xc   : > { %p77_p6 = scmp.eq.s32.totalorder %s4408_s12, 1  ;;  %p36_p7 = scmp.eq.s32.totalorder %s33_s17, 0 }
   0xd   : > { %p4729_p8 = por %p52_p5, %p51_p3  ;;  %p83_p10 = scmp.eq.s32.totalorder %s4409_s13, 1 }
   0xe   : > { %p4733_p9 = por %p77_p6, %p45_p1  ;;  %p4464_p13 = scmp.lt.s32.totalorder %s4647_s11, 2 }
   0xf   : > { %s4738_s20 = scalar_select %p36_p7, %s4635_s8, %s38_s15  }
  0x10   : > { %s5496_s19 = scalar_select %p4733_p9, 1, 0 }
  0x11   : > { %p4740_p11 = por %p83_p10, %p51_p3  ;;  %s103_s22 = sand.u32 1, %s4635_s8  }
  0x12   : > { %s4412_s23 = sshll.u32 %s103_s22, 6  ;;  %s4450_s24 = sshll.u32 %s4643_s10, 10 }
  0x13   : > { %s5497_s21 = scalar_select %p4740_p11, 1, 0 }
  0x14   : > { %s4751_s27 = scalar_lea.hbm %s5491_s0, %s4450_s24  ;;  %s107_s28 = scalar_lea.vmem [#allocation2], %s4412_s23 }
  0x15   : > { %s117_s29 = sshll.u32 %s107_s28, 4  ;;  %p4757_p0 = pnand %p4464_p13, %p4723_p4  ;;  %s4753_s29 = int_to_ptr.vmem [resolvable:$true] %s117_s29 }
  0x16   : > { %s4762_s2 = scalar_lea.sflag [#allocation3], %s103_s22  ;;  %s4535_s3 = scalar_lea.hbm %s4751_s27, 1024 }
  0x17   : > { %p4536_p2 = scmp.ne.s32.totalorder %s4751_s27, %s4535_s3  ;;  %p4537_p3 = pneg %p4757_p0 }
  0x18   : > { %s4540_s12 = scalar_lea.hbm %s5491_s0, 2048  ;;  %p4541_p4 = scmp.lt.u32.totalorder %s4751_s27, %s5491_s0 }
  0x19   : > { %p4538_p5 = pnand %p4537_p3, %p4536_p2  ;;  %p4542_p7 = scmp.lt.u32.totalorder %s4540_s12, %s4535_s3 }
  0x1a   : > { %p4544_p13 = scmp.lt.u32.totalorder %s4535_s3, %s4751_s27 }
  0x1b   : > { %p4539_p6 = pneg %p4538_p5  ;;  %p4543_p10 = por %p4542_p7, %p4541_p4 }
  0x1d   : > { %p4545_p12 = por %p4544_p13, %p4543_p10 }
  0x1f   : > { %p4546_p1 = pnand %p4545_p12, %p4539_p6 }
  0x21   : > { %4549 = shalt.err (!%p4546_p1)
}
  0x22   : > { %s4550_s16 = scalar_lea.vmem %s4753_s29, 1024  ;;  %s4649_s17 = smov [#allocation2]  }
  0x23   : > { %p4551_p2 = scmp.ne.s32.totalorder %s4753_s29, %s4550_s16  ;;  %s4555_s22 = sshll.u32 %s4649_s17, 4  ;;  %s4556_s22 = int_to_ptr.vmem [resolvable:$false] %s4555_s22 }
  0x24   : > { %s4557_s23 = scalar_lea.vmem %s4556_s22, 2048  ;;  %p4558_p9 = scmp.lt.s32.totalorder %s4753_s29, %s4556_s22 }
  0x25   : > { %p4553_p5 = pnand %p4551_p2, %p4537_p3  ;;  %p4559_p4 = scmp.lt.s32.totalorder %s4557_s23, %s4550_s16 }
  0x27   : > { %p4554_p11 = pneg %p4553_p5  ;;  %p4560_p7 = por %p4559_p4, %p4558_p9 }
  0x29   : > { %p4561_p10 = pnand %p4560_p7, %p4554_p11 }
  0x2b   : > { %4564 = shalt.err (!%p4561_p10)
}
  0x2c   : > { %s4650_s24 = smov 128   ;;  %s4651_s25 = smov 8  }
  0x2d   : > { %4459 = dma.hbm_to_vmem [thread:$0]  (!%p4757_p0), %s4751_s27, 1024, %s4753_s29, %s4762_s2, %s4650_s24, %s4650_s24, %s4651_s25  }
  0x2e   : > { %p125_p12 = scmp.lt.s32.totalorder %s4647_s11, 3  ;;  %p5499_p1 = scmp.ge.s32.totalorder %s4647_s11, 1 }
  0x30   : > { %p126_p3 = pnand %p5499_p1, %p125_p12 }
  0x31   : > { %s4794_s26 = sand.u32 (!%p126_p3), 1, %s4631_s7  }
  0x32   : > { %129 = sbr.rel (%p126_p3) target bundleno = 1084 (0x43c), region = 24  ;;  %s4417_s28 = sshll.u32 (!%p126_p3), %s4794_s26, 6 }
  0x33   : > { %s132_s3 = scalar_lea.sflag (!%p126_p3), [#allocation3], %s4794_s26  ;;  %s4798_s4 = scalar_lea.vmem (!%p126_p3), [#allocation2], %s4417_s28 }
  0x39   : > { %4618 = dma.done.wait (%p4729_p8), %s132_s3, 1024  }
  0x3a   : > { %4620 = vsyncadd (%p4729_p8), %s132_s3, 4294966272  ;;  %v4805_v0 = vld [vmem:[%s4798_s4] sm:$0xff]  ;;  %s4652_s27 = smov 124   ;;  %s4653_s29 = smov 126   ;;  %v4812_v1 = vld [vmem:[%s4798_s4 + $0x8] sm:$0xff]  ;;  %v208_v12 = vlaneseq  ;;  %vm1183_vm0 = vcmask 64512  }
  0x3b   : > { %167 = vrot.lane.b32.xlu1 %v4805_v0, %s4652_s27  ;;  %161 = vrot.lane.b32.xlu0 %v4805_v0, %s4653_s29  ;;  %s4654_s18 = smov 122   ;;  %s4655_s30 = smov 120   ;;  %v4839_v2 = vld [vmem:[%s4798_s4 + $0x10] sm:$0xff]  ;;  %v4842_v3 = vld [vmem:[%s4798_s4 + $0x18] sm:$0xff]  ;;  %v4659_v10 = vmov 1983009808  }
  0x3c   : > { %s4656_s2 = smov 118   ;;  %s4657_s5 = smov 116   ;;  %v206_v11 = vunpack.c.l.s4 %v4659_v10  ;;  %v209_v16 = vshrl.u32 %v208_v12, 7  ;;  %v4660_v19 = vmov 1934713408   ;;  %vm1185_vm1 = vcmask 130048  }
  0x3d   : > { %s4658_s12 = smov 114   ;;  %v270_v20 = vunpack.c.l.s4 %v4660_v19  ;;  %s4661_s13 = smov 16   ;;  %vm1187_vm2 = vcmask 195584   ;;  %vm1189_vm3 = vcmask 261120   ;;  %vm1191_vm4 = vcmask 326656  }
  0x3e   : > { %v207_v15 = vunpack.c.0.s8 %v206_v11  ;;  %s4663_s15 = smov 8   ;;  %s4664_s16 = smov 32   ;;  %vm1193_vm5 = vcmask 392192   ;;  %vm1195_vm6 = vcmask 457728   ;;  %vm1197_vm7 = vcmask 519168  }
  0x3f   : > { %169 = vrot.lane.b32.xlu1 %v4812_v1, %s4652_s27  ;;  %163 = vrot.lane.b32.xlu0 %v4812_v1, %s4653_s29  ;;  %v271_v26 = vunpack.c.0.s8 %v270_v20  ;;  %s4665_s17 = smov 40   ;;  %s4666_s22 = smov 48  }
  0x40   : > { %v4882_v21 = vsub.s32 %v207_v15, %v209_v16  ;;  %s4667_s23 = smov 56   ;;  %s4668_s24 = smov 24  }
  0x41   : > { %v4892_v40 = vsub.s32 %v271_v26, %v209_v16  ;;  %s4418_s25 = sshll.u32 %s4794_s26, 4  ;;  %p5500_p9 = scmp.ne.s32.totalorder %s5496_s19, 0 }
  0x42   : > { %s5117_s28 = scalar_lea.vmem [#allocation5], %s4418_s25 }
  0x43   : > { %175 = vrot.lane.b32.xlu1 %v4812_v1, %s4654_s18  ;;  %173 = vrot.lane.b32.xlu0 %v4805_v0, %s4654_s18  ;;  %s4322_s3 = sshll.u32 %s5117_s28, 4  ;;  %s5431_s3 = int_to_ptr.vmem [resolvable:$true] %s4322_s3 }
  0x47   : > { %181 = vrot.lane.b32.xlu1 %v4812_v1, %s4655_s30  ;;  %179 = vrot.lane.b32.xlu0 %v4805_v0, %s4655_s30 }
  0x4b   : > { %187 = vrot.lane.b32.xlu1 %v4812_v1, %s4656_s2  ;;  %185 = vrot.lane.b32.xlu0 %v4805_v0, %s4656_s2 }
  0x4f   : > { %193 = vrot.lane.b32.xlu1 %v4812_v1, %s4657_s5  ;;  %191 = vrot.lane.b32.xlu0 %v4805_v0, %s4657_s5 }
  0x53   : > { %199 = vrot.lane.b32.xlu1 %v4812_v1, %s4658_s12  ;;  %197 = vrot.lane.b32.xlu0 %v4805_v0, %s4658_s12 }
  0x57   : > { %1204 = vrot.lane.b32.xlu1 %v4839_v2, %s4653_s29  ;;  %1206 = vrot.lane.b32.xlu0 %v4842_v3, %s4653_s29 }
  0x5b   : > { %1210 = vrot.lane.b32.xlu1 %v4839_v2, %s4652_s27  ;;  %1212 = vrot.lane.b32.xlu0 %v4842_v3, %s4652_s27 }
  0x5f   : > { %1216 = vrot.lane.b32.xlu1 %v4839_v2, %s4654_s18  ;;  %1218 = vrot.lane.b32.xlu0 %v4842_v3, %s4654_s18 }
  0x63   : > { %1222 = vrot.lane.b32.xlu1 %v4839_v2, %s4655_s30  ;;  %1224 = vrot.lane.b32.xlu0 %v4842_v3, %s4655_s30 }
  0x67   : > { %1228 = vrot.lane.b32.xlu1 %v4839_v2, %s4656_s2  ;;  %1230 = vrot.lane.b32.xlu0 %v4842_v3, %s4656_s2 }
  0x6b   : > { %1234 = vrot.lane.b32.xlu1 %v4839_v2, %s4657_s5  ;;  %1236 = vrot.lane.b32.xlu0 %v4842_v3, %s4657_s5 }
  0x6f   : > { %1240 = vrot.lane.b32.xlu1 %v4839_v2, %s4658_s12  ;;  %1242 = vrot.lane.b32.xlu0 %v4842_v3, %s4658_s12 }
  0xad   : > { %v168_v4 = vpop.permute.xlu1 %167  ;;  %v162_v5 = vpop.permute.xlu0 %161 }
  0xae   : > { %v203_v22 = vcombine.low %v4805_v0, %v168_v4  ;;  %v204_v27 = vcombine.high %v4805_v0, %v168_v4 }
  0xb0   : > { %v211_v28 = vrot.slane %v203_v22, %v4882_v21  ;;  %v218_v37 = vrot.slane %v204_v27, %v4882_v21 }
  0xb1   : > { %v4872_v6 = vpop.permute.xlu1 %169  ;;  %v4874_v7 = vpop.permute.xlu0 %163 }
  0xb2   : > { %v339_v45 = vcombine.low %v4812_v1, %v4872_v6  ;;  %v340_v53 = vcombine.high %v4812_v1, %v4872_v6 }
  0xb4   : > { %v347_v59 = vrot.slane %v339_v45, %v4882_v21 }
  0xb5   : > { %v4876_v8 = vpop.permute.xlu1 %175  ;;  %v174_v9 = vpop.permute.xlu0 %173 }
  0xb6   : > { %v219_v23 = vcombine.low %v162_v5, %v174_v9  ;;  %v220_v29 = vcombine.high %v162_v5, %v174_v9  ;;  %v355_v54 = vcombine.low %v4874_v7, %v4876_v8  ;;  %v356_v9 = vcombine.high %v4874_v7, %v4876_v8 }
  0xb8   : > { %v227_v30 = vrot.slane %v219_v23, %v4882_v21  ;;  %v234_v38 = vrot.slane %v220_v29, %v4882_v21  ;;  %v363_v10 = vrot.slane %v355_v54, %v4882_v21  ;;  %v354_v23 = vrot.slane %v340_v53, %v4882_v21 }
  0xb9   : > { %v4878_v13 = vpop.permute.xlu1 %181  ;;  %v180_v14 = vpop.permute.xlu0 %179 }
  0xba   : > { %v267_v39 = vcombine.low %v211_v28, %v227_v30  ;;  %v283_v57 = vcombine.low %v218_v37, %v234_v38  ;;  %v268_v58 = vcombine.high %v211_v28, %v227_v30  ;;  %v284_v16 = vcombine.high %v218_v37, %v234_v38 }
  0xbb   : > { %v403_v26 = vcombine.low %v347_v59, %v363_v10 }
  0xbc   : > { %v275_v55 = vrot.slane %v267_v39, %v4892_v40  ;;  %v282_v15 = vrot.slane %v268_v58, %v4892_v40 }
  0xbd   : > { %v4880_v17 = vpop.permute.xlu1 %187  ;;  %v186_v18 = vpop.permute.xlu0 %185 }
  0xc1   : > { %v4885_v24 = vpop.permute.xlu1 %193  ;;  %v192_v25 = vpop.permute.xlu0 %191 }
  0xc2   : > { %v235_v31 = vcombine.low %v180_v14, %v192_v25  ;;  %v236_v32 = vcombine.high %v180_v14, %v192_v25  ;;  %v371_v46 = vcombine.low %v4878_v13, %v4885_v24  ;;  %v372_v11 = vcombine.high %v4878_v13, %v4885_v24 }
  0xc3   : > { %v291_v14 = vrot.slane %v283_v57, %v4892_v40  ;;  %v370_v13 = vrot.slane %v356_v9, %v4882_v21  ;;  %v298_v25 = vrot.slane %v284_v16, %v4892_v40 }
  0xc4   : > { %v243_v41 = vrot.slane %v235_v31, %v4882_v21  ;;  %v250_v42 = vrot.slane %v236_v32, %v4882_v21  ;;  %v379_v60 = vrot.slane %v371_v46, %v4882_v21 }
  0xc5   : > { %v200_v33 = vpop.permute.xlu1 %199  ;;  %v198_v34 = vpop.permute.xlu0 %197  ;;  %v419_v37 = vcombine.low %v354_v23, %v370_v13 }
  0xc6   : > { %v251_v35 = vcombine.low %v186_v18, %v198_v34  ;;  %v252_v36 = vcombine.high %v186_v18, %v198_v34  ;;  %v387_v47 = vcombine.low %v4880_v17, %v200_v33  ;;  %v388_v12 = vcombine.high %v4880_v17, %v200_v33 }
  0xc7   : > { %v386_v17 = vrot.slane %v372_v11, %v4882_v21 }
  0xc8   : > { %v259_v43 = vrot.slane %v251_v35, %v4882_v21  ;;  %v266_v44 = vrot.slane %v252_v36, %v4882_v21  ;;  %v395_v61 = vrot.slane %v387_v47, %v4882_v21  ;;  %v402_v24 = vrot.slane %v388_v12, %v4882_v21 }
  0xc9   : > { %v4903_v48 = vpop.permute.xlu1 %1204  ;;  %v4905_v49 = vpop.permute.xlu0 %1206  ;;  %v404_v36 = vcombine.high %v347_v59, %v363_v10 }
  0xca   : > { %v299_v50 = vcombine.low %v243_v41, %v259_v43  ;;  %v315_v51 = vcombine.low %v250_v42, %v266_v44  ;;  %v300_v52 = vcombine.high %v243_v41, %v259_v43  ;;  %v316_v62 = vcombine.high %v250_v42, %v266_v44 }
  0xcb   : > { %v435_v8 = vcombine.low %v379_v60, %v395_v61  ;;  %v436_v28 = vcombine.high %v379_v60, %v395_v61  ;;  %v451_v38 = vcombine.low %v386_v17, %v402_v24  ;;  %v411_v41 = vrot.slane %v403_v26, %v4892_v40 }
  0xcc   : > { %v307_v56 = vrot.slane %v299_v50, %v4892_v40  ;;  %v323_v5 = vrot.slane %v315_v51, %v4892_v40  ;;  %v314_v6 = vrot.slane %v300_v52, %v4892_v40  ;;  %v330_v7 = vrot.slane %v316_v62, %v4892_v40 }
  0xcd   : > { %v4916_v63 = vpop.permute.xlu1 %1210  ;;  %v4918_v0 = vpop.permute.xlu0 %1212  ;;  %v443_v34 = vrot.slane %v435_v8, %v4892_v40  ;;  %v420_v42 = vcombine.high %v354_v23, %v370_v13  ;;  %v452_v43 = vcombine.high %v386_v17, %v402_v24  ;;  %v450_v54 = vrot.slane %v436_v28, %v4892_v40 }
  0xce   : > { %v332_v1 = vcombine.high %v275_v55, %v307_v56  ;;  %v331_v4 = vcombine.low %v275_v55, %v307_v56  ;;  %v336_v20 = vcombine.high %v291_v14, %v323_v5  ;;  %v333_v22 = vcombine.low %v282_v15, %v314_v6 }
  0xcf   : > { %v1383_v27 = vcombine.high %v4842_v3, %v4918_v0  ;;  %v338_v32 = vcombine.high %v298_v25, %v330_v7  ;;  %v334_v33 = vcombine.high %v282_v15, %v314_v6  ;;  %v1246_v44 = vcombine.low %v4839_v2, %v4916_v63 }
  0xd0   : > { %507 = vxpose.xlu1.b32.start.end [1/1] (short) (narrow) %v332_v1, 8  ;;  %475 = vxpose.xlu0.b32.start.end [1/1] (short) (narrow) %v331_v4, 8  ;;  %v1247_v45 = vcombine.high %v4839_v2, %v4916_v63  ;;  %v468_v52 = vcombine.high %v411_v41, %v443_v34  ;;  %v335_v53 = vcombine.low %v291_v14, %v323_v5 }
  0xd1   : > { %v1217_v18 = vpop.permute.xlu1 %1216  ;;  %v4930_v19 = vpop.permute.xlu0 %1218  ;;  %v4946_v35 = vrot.slane %v1383_v27, %v4882_v21  ;;  %v418_v56 = vrot.slane %v404_v36, %v4892_v40  ;;  %v4963_v57 = vrot.slane %v451_v38, %v4892_v40  ;;  %v4966_v2 = vrot.slane %v419_v37, %v4892_v40 }
  0xd2   : > { %v1399_v30 = vcombine.high %v4905_v49, %v4930_v19  ;;  %v1262_v46 = vcombine.low %v4903_v48, %v1217_v18  ;;  %v1263_v47 = vcombine.high %v4903_v48, %v1217_v18  ;;  %v4969_v48 = vrot.slane %v420_v42, %v4892_v40 }
  0xd3   : > { %v4972_v58 = vrot.slane %v452_v43, %v4892_v40  ;;  %v4975_v59 = vrot.slane %v1246_v44, %v4882_v21  ;;  %v1261_v60 = vrot.slane %v1247_v45, %v4882_v21  ;;  %v470_v4 = vcombine.high %v418_v56, %v450_v54 }
  0xd4   : > { %635 = vxpose.xlu1.b32.start.end [1/1] (short) (narrow) %v336_v20, 8  ;;  %539 = vxpose.xlu0.b32.start.end [1/1] (short) (narrow) %v333_v22, 8  ;;  %v4949_v39 = vrot.slane %v1399_v30, %v4882_v21  ;;  %v4979_v61 = vrot.slane %v1262_v46, %v4882_v21  ;;  %v1277_v62 = vrot.slane %v1263_v47, %v4882_v21 }
  0xd5   : > { %v1223_v29 = vpop.permute.xlu1 %1222  ;;  %v4942_v31 = vpop.permute.xlu0 %1224  ;;  %v337_v5 = vcombine.low %v298_v25, %v330_v7  ;;  %v472_v10 = vcombine.high %v4966_v2, %v4963_v57  ;;  %v467_v12 = vcombine.low %v411_v41, %v443_v34  ;;  %v474_v14 = vcombine.high %v4969_v48, %v4972_v58 }
  0xd6   : > { %v1463_v55 = vcombine.high %v4946_v35, %v4949_v39  ;;  %v1382_v15 = vcombine.low %v4842_v3, %v4918_v0  ;;  %v1398_v20 = vcombine.low %v4905_v49, %v4930_v19  ;;  %v1310_v22 = vcombine.low %v4975_v59, %v4979_v61 }
  0xd7   : > { %v1326_v8 = vcombine.low %v1261_v60, %v1277_v62  ;;  %v469_v25 = vcombine.low %v418_v56, %v450_v54  ;;  %v1327_v30 = vcombine.high %v1261_v60, %v1277_v62 }
  0xd8   : > { %699 = vxpose.xlu1.b32.start.end [1/1] (short) (narrow) %v338_v32, 8  ;;  %571 = vxpose.xlu0.b32.start.end [1/1] (short) (narrow) %v334_v33, 8  ;;  %v1390_v49 = vrot.slane %v1382_v15, %v4882_v21  ;;  %v1406_v28 = vrot.slane %v1398_v20, %v4882_v21  ;;  %v1462_v32 = vcombine.low %v4946_v35, %v4949_v39 }
  0xd9   : > { %v1229_v50 = vpop.permute.xlu1 %1228  ;;  %v1231_v51 = vpop.permute.xlu0 %1230  ;;  %v1334_v34 = vrot.slane %v1326_v8, %v4892_v40  ;;  %v1341_v56 = vrot.slane %v1327_v30, %v4892_v40  ;;  %v5025_v60 = vrot.slane %v1463_v55, %v4892_v40 }
  0xda   : > { %v5011_v46 = vrot.slane %v1462_v32, %v4892_v40  ;;  %v1447_v39 = vcombine.high %v1390_v49, %v1406_v28 }
  0xdc   : > { %763 = vxpose.xlu1.b32.start.end [1/1] (short) (narrow) %v468_v52, 8  ;;  %603 = vxpose.xlu0.b32.start.end [1/1] (short) (narrow) %v335_v53, 8  ;;  %v1311_v52 = vcombine.high %v4975_v59, %v4979_v61  ;;  %v1446_v53 = vcombine.low %v1390_v49, %v1406_v28  ;;  %v473_v61 = vcombine.low %v4969_v48, %v4972_v58 }
  0xdd   : > { %v1235_v63 = vpop.permute.xlu1 %1234  ;;  %v1237_v1 = vpop.permute.xlu0 %1236  ;;  %v1461_v58 = vrot.slane %v1447_v39, %v4892_v40 }
  0xde   : > { %v1278_v6 = vcombine.low %v1223_v29, %v1235_v63  ;;  %v1279_v9 = vcombine.high %v1223_v29, %v1235_v63  ;;  %v1415_v11 = vcombine.high %v4942_v31, %v1237_v1  ;;  %v1414_v26 = vcombine.low %v4942_v31, %v1237_v1 }
  0xdf   : > { %v1318_v31 = vrot.slane %v1310_v22, %v4892_v40  ;;  %v1325_v1 = vrot.slane %v1311_v52, %v4892_v40  ;;  %v1454_v35 = vrot.slane %v1446_v53, %v4892_v40 }
  0xe0   : > { %827 = vxpose.xlu1.b32.start.end [1/1] (short) (narrow) %v470_v4, 8  ;;  %667 = vxpose.xlu0.b32.start.end [1/1] (short) (narrow) %v337_v5, 8  ;;  %v1286_v16 = vrot.slane %v1278_v6, %v4882_v21  ;;  %v1293_v23 = vrot.slane %v1279_v9, %v4882_v21  ;;  %v1429_v3 = vrot.slane %v1415_v11, %v4882_v21 }
  0xe1   : > { %v1241_v18 = vpop.permute.xlu1 %1240  ;;  %v1243_v7 = vpop.permute.xlu0 %1242  ;;  %v1422_v37 = vrot.slane %v1414_v26, %v4882_v21 }
  0xe2   : > { %v1294_v13 = vcombine.low %v1229_v50, %v1241_v18  ;;  %v1295_v17 = vcombine.high %v1229_v50, %v1241_v18  ;;  %v1431_v24 = vcombine.high %v1231_v51, %v1243_v7  ;;  %v1430_v0 = vcombine.low %v1231_v51, %v1243_v7 }
  0xe3   : > { %v471_v50 = vcombine.low %v4966_v2, %v4963_v57 }
  0xe4   : > { %891 = vxpose.xlu1.b32.start.end [1/1] (short) (narrow) %v472_v10, 8  ;;  %731 = vxpose.xlu0.b32.start.end [1/1] (short) (narrow) %v467_v12, 8  ;;  %v1302_v19 = vrot.slane %v1294_v13, %v4882_v21  ;;  %v1309_v27 = vrot.slane %v1295_v17, %v4882_v21  ;;  %v1445_v29 = vrot.slane %v1431_v24, %v4882_v21 }
  0xe5   : > { %v1438_v38 = vrot.slane %v1430_v0, %v4882_v21 }
  0xe6   : > { %v1342_v33 = vcombine.low %v1286_v16, %v1302_v19  ;;  %v1358_v36 = vcombine.low %v1293_v23, %v1309_v27  ;;  %v1494_v41 = vcombine.low %v1429_v3, %v1445_v29  ;;  %v1495_v42 = vcombine.high %v1429_v3, %v1445_v29 }
  0xe7   : > { %v1359_v45 = vcombine.high %v1293_v23, %v1309_v27  ;;  %v1343_v54 = vcombine.high %v1286_v16, %v1302_v19  ;;  %v1478_v57 = vcombine.low %v1422_v37, %v1438_v38  ;;  %v1479_v4 = vcombine.high %v1422_v37, %v1438_v38 }
  0xe8   : > { %955 = vxpose.xlu1.b32.start.end [1/1] (short) (narrow) %v474_v14, 8  ;;  %795 = vxpose.xlu0.b32.start.end [1/1] (short) (narrow) %v469_v25, 8  ;;  %v1350_v43 = vrot.slane %v1342_v33, %v4892_v40  ;;  %v1366_v44 = vrot.slane %v1358_v36, %v4892_v40  ;;  %v5014_v47 = vrot.slane %v1494_v41, %v4892_v40 }
  0xe9   : > { %v1373_v63 = vrot.slane %v1359_v45, %v4892_v40  ;;  %v5031_v59 = vrot.slane %v1495_v42, %v4892_v40  ;;  %v1357_v55 = vrot.slane %v1343_v54, %v4892_v40  ;;  %v1486_v48 = vrot.slane %v1478_v57, %v4892_v40 }
  0xea   : > { %v1374_v51 = vcombine.low %v1318_v31, %v1350_v43  ;;  %v1378_v62 = vcombine.low %v1334_v34, %v1366_v44  ;;  %v1515_v2 = vcombine.high %v5011_v46, %v5014_v47  ;;  %v1375_v9 = vcombine.high %v1318_v31, %v1350_v43 }
  0xeb   : > { %v1517_v5 = vcombine.high %v5025_v60, %v5031_v59  ;;  %v1516_v6 = vcombine.low %v5025_v60, %v5031_v59  ;;  %v1380_v10 = vcombine.low %v1341_v56, %v1373_v63  ;;  %v1376_v11 = vcombine.low %v1325_v1, %v1357_v55 }
  0xec   : > { %859 = vxpose.xlu0.b32.start.end [1/1] (short) (narrow) %v471_v50, 8  ;;  %1518 = vxpose.xlu1.b32.start.end [1/1] (short) (narrow) %v1374_v51, 8  ;;  %v1510_v12 = vcombine.low %v1454_v35, %v1486_v48  ;;  %v1493_v14 = vrot.slane %v1479_v4, %v4892_v40  ;;  %v1377_v15 = vcombine.high %v1325_v1, %v1357_v55 }
  0xed   : > { %v1379_v18 = vcombine.high %v1334_v34, %v1366_v44  ;;  %v1514_v20 = vcombine.low %v5011_v46, %v5014_v47  ;;  %v1381_v22 = vcombine.high %v1341_v56, %v1373_v63  ;;  %v1511_v7 = vcombine.high %v1454_v35, %v1486_v48 }
  0xee   : > { %v1512_v16 = vcombine.low %v1461_v58, %v1493_v14  ;;  %v1513_v8 = vcombine.high %v1461_v58, %v1493_v14 }
  0xf0   : > { %923 = vxpose.xlu0.b32.start.end [1/1] (short) (narrow) %v473_v61, 8  ;;  %1646 = vxpose.xlu1.b32.start.end [1/1] (short) (narrow) %v1378_v62, 8 }
  0xf4   : > { %1550 = vxpose.xlu0.b32.start.end [1/1] (short) (narrow) %v1375_v9, 8  ;;  %1710 = vxpose.xlu1.b32.start.end [1/1] (short) (narrow) %v1380_v10, 8  ;;  %v4662_v10 = vmov 0.0  }
  0xf8   : > { %1582 = vxpose.xlu0.b32.start.end [1/1] (short) (narrow) %v1376_v11, 8  ;;  %1774 = vxpose.xlu1.b32.start.end [1/1] (short) (narrow) %v1510_v12, 8 }
  0xfc   : > { %1614 = vxpose.xlu0.b32.start.end [1/1] (short) (narrow) %v1377_v15, 8  ;;  %1838 = vxpose.xlu1.b32.start.end [1/1] (short) (narrow) %v1512_v16, 8 }
 0x100   : > { %1678 = vxpose.xlu0.b32.start.end [1/1] (short) (narrow) %v1379_v18, 8  ;;  %1902 = vxpose.xlu1.b32.start.end [1/1] (short) (narrow) %v1514_v20, 8 }
 0x104   : > { %1742 = vxpose.xlu0.b32.start.end [1/1] (short) (narrow) %v1381_v22, 8 }
 0x108   : > { %1806 = vxpose.xlu0.b32.start.end [1/1] (short) (narrow) %v1511_v7, 8 }
 0x10c   : > { %1870 = vxpose.xlu0.b32.start.end [1/1] (short) (narrow) %v1513_v8, 8 }
 0x150   : > { %v523_v23 = vpop.trf.xlu1  ;;  %v491_v13 = vpop.trf.xlu0 }
 0x154   : > { %v651_v17 = vpop.trf.xlu1  ;;  %v555_v24 = vpop.trf.xlu0 }
 0x155   : > { %v1037_v3 = vcombine.low %v523_v23, %v651_v17 }
 0x157   : > { %v1044_v27 = vrot.slane %v1037_v3, %v4882_v21 }
 0x158   : > { %v715_v25 = vpop.trf.xlu1  ;;  %v587_v26 = vpop.trf.xlu0 }
 0x159   : > { %v1045_v0 = vcombine.low %v587_v26, %v715_v25 }
 0x15b   : > { %v1052_v28 = vrot.slane %v1045_v0, %v4882_v21 }
 0x15c   : > { %v779_v49 = vpop.trf.xlu1  ;;  %v619_v19 = vpop.trf.xlu0 }
 0x15d   : > { %v987_v29 = vcombine.low %v491_v13, %v619_v19  ;;  %v1069_v33 = vcombine.low %v1044_v27, %v1052_v28 }
 0x15f   : > { %v994_v34 = vrot.slane %v987_v29, %v4882_v21  ;;  %v1076_v42 = vrot.slane %v1069_v33, %v4892_v40 }
 0x160   : > { %v843_v30 = vpop.trf.xlu1  ;;  %v683_v32 = vpop.trf.xlu0 }
 0x161   : > { %v995_v31 = vcombine.low %v555_v24, %v683_v32 }
 0x163   : > { %v1002_v36 = vrot.slane %v995_v31, %v4882_v21 }
 0x164   : > { %v907_v37 = vpop.trf.xlu1  ;;  %v747_v38 = vpop.trf.xlu0 }
 0x165   : > { %v1019_v41 = vcombine.low %v994_v34, %v1002_v36  ;;  %v1053_v62 = vcombine.low %v779_v49, %v907_v37 }
 0x167   : > { %v1026_v43 = vrot.slane %v1019_v41, %v4892_v40  ;;  %v1060_v4 = vrot.slane %v1053_v62, %v4882_v21 }
 0x168   : > { %v971_v44 = vpop.trf.xlu1  ;;  %v811_v45 = vpop.trf.xlu0 }
 0x169   : > { %v4419_v50 = vcombine.low %v1026_v43, %v1076_v42  ;;  %v4421_v51 = vcombine.high %v1026_v43, %v1076_v42  ;;  %v1061_v52 = vcombine.low %v843_v30, %v971_v44 }
 0x16b   : > { %v1095_v53 = vrot.slane %v4419_v50, %v4882_v21  ;;  %v1111_v54 = vrot.slane %v4421_v51, %v4882_v21  ;;  %v1068_v61 = vrot.slane %v1061_v52, %v4882_v21 }
 0x16c   : > { %v875_v56 = vpop.trf.xlu0  ;;  %v1534_v49 = vpop.trf.xlu1 }
 0x16d   : > { %v1120_v63 = vcombine.high %v1095_v53, %v1111_v54  ;;  %v1119_v57 = vcombine.low %v1095_v53, %v1111_v54  ;;  %v1003_v1 = vcombine.low %v747_v38, %v875_v56  ;;  %v1077_v58 = vcombine.low %v1060_v4, %v1068_v61 }
 0x16f   : > { %v1134_v35 = vrot.slane %v1120_v63, %v4892_v40  ;;  %v5058_v39 = vrot.slane %v1119_v57, %v4892_v40  ;;  %v1010_v11 = vrot.slane %v1003_v1, %v4882_v21  ;;  %v1084_v15 = vrot.slane %v1077_v58, %v4892_v40 }
 0x170   : > { %v939_v55 = vpop.trf.xlu0  ;;  %v1662_v27 = vpop.trf.xlu1 }
 0x171   : > { %v1011_v9 = vcombine.low %v811_v45, %v939_v55  ;;  %1160 = vrot.lane.b32.xlu1 %v1134_v35, %s4661_s13  ;;  %v1151_v48 = vcombine.high %v5058_v39, %v4662_v10  ;;  %v1152_v26 = vcombine.high %v1134_v35, %v4662_v10  ;;  %v2030_v32 = vcombine.low %v1534_v49, %v1662_v27 }
 0x173   : > { %v1018_v12 = vrot.slane %v1011_v9, %v4882_v21  ;;  %1156 = vrot.lane.b32.xlu0 %v1151_v48, %s4663_s15  ;;  %v2037_v36 = vrot.slane %v2030_v32, %v4882_v21 }
 0x174   : > { %v1566_v3 = vpop.trf.xlu0  ;;  %v1726_v29 = vpop.trf.xlu1 }
 0x175   : > { %v1027_v14 = vcombine.low %v1010_v11, %v1018_v12 }
 0x177   : > { %v1034_v16 = vrot.slane %v1027_v14, %v4892_v40 }
 0x178   : > { %v1598_v0 = vpop.trf.xlu0  ;;  %v1790_v53 = vpop.trf.xlu1 }
 0x179   : > { %v4420_v18 = vcombine.low %v1034_v16, %v1084_v15  ;;  %v4422_v20 = vcombine.high %v1034_v16, %v1084_v15  ;;  %v2038_v33 = vcombine.low %v1598_v0, %v1726_v29 }
 0x17b   : > { %v1102_v22 = vrot.slane %v4420_v18, %v4882_v21  ;;  %v1118_v7 = vrot.slane %v4422_v20, %v4882_v21  ;;  %v2045_v38 = vrot.slane %v2038_v33, %v4882_v21 }
 0x17c   : > { %v1630_v19 = vpop.trf.xlu0  ;;  %v1854_v54 = vpop.trf.xlu1 }
 0x17d   : > { %v1135_v8 = vcombine.low %v1102_v22, %v1118_v7  ;;  %v1136_v23 = vcombine.high %v1102_v22, %v1118_v7  ;;  %v2062_v46 = vcombine.low %v2037_v36, %v2045_v38  ;;  %v5145_v38 = vld [vmem:[%s4798_s4 + $0x28] sm:$0xff] }
 0x17f   : > { %v1143_v13 = vrot.slane %v1135_v8, %v4892_v40  ;;  %v1150_v24 = vrot.slane %v1136_v23, %v4892_v40 }
 0x180   : > { %v1694_v28 = vpop.trf.xlu0  ;;  %v1918_v62 = vpop.trf.xlu1 }
 0x181   : > { %1168 = vrot.lane.b32.xlu1 %v1143_v13, %s4664_s16  ;;  %v1153_v17 = vcombine.high %v1143_v13, %v4662_v10  ;;  %v1154_v25 = vcombine.high %v1150_v24, %v4662_v10  ;;  %v2080_v31 = vcombine.low %v1566_v3, %v1694_v28  ;;  %v2046_v7 = vcombine.low %v1790_v53, %v1918_v62 }
 0x183   : > { %1172 = vrot.lane.b32.xlu0 %v1153_v17, %s4665_s17  ;;  %v2087_v37 = vrot.slane %v2080_v31, %v4882_v21 }
 0x184   : > { %v1758_v30 = vpop.trf.xlu0 }
 0x185   : > { %1176 = vrot.lane.b32.xlu1 %v1150_v24, %s4666_s22  ;;  %v2088_v34 = vcombine.low %v1630_v19, %v1758_v30  ;;  %v2053_v24 = vrot.slane %v2046_v7, %v4882_v21 }
 0x187   : > { %1180 = vrot.lane.b32.xlu0 %v1154_v25, %s4667_s23  ;;  %v2095_v41 = vrot.slane %v2088_v34, %v4882_v21  ;;  %v5134_v34 = vld [vmem:[%s4798_s4 + $0x20] sm:$0xff] }
 0x188   : > { %v1822_v56 = vpop.trf.xlu0 }
 0x189   : > { %1164 = vrot.lane.b32.xlu1 %v1152_v26, %s4668_s24  ;;  %v2112_v47 = vcombine.low %v2087_v37, %v2095_v41  ;;  %v5168_v41 = vld [vmem:[%s4798_s4 + $0x30] sm:$0xff] }
 0x18c   : > { %v1886_v63 = vpop.trf.xlu0 }
 0x1a5   : > { %1934 = vxpose.xlu0.b32.start.end [1/1] (short) (narrow) %v1515_v2, 8  ;;  %v2069_v2 = vrot.slane %v2062_v46, %v4892_v40  ;;  %v5187_v46 = vld [vmem:[%s4798_s4 + $0x38] sm:$0xff]  ;;  %s4451_s4 = sshll.u32 %s4639_s9, 8  ;;  %s4308_s9 = scalar_lea.sflag [#allocation4], %s4794_s26 }
 0x1a9   : > { %1998 = vxpose.xlu0.b32.start.end [1/1] (short) (narrow) %v1517_v5, 8  ;;  %v2119_v5 = vrot.slane %v2112_v47, %v4892_v40 }
 0x1ab   : > { %v4425_v42 = vcombine.low %v2069_v2, %v2119_v5  ;;  %v4427_v43 = vcombine.high %v2069_v2, %v2119_v5 }
 0x1ad   : > { %v2138_v44 = vrot.slane %v4425_v42, %v4882_v21  ;;  %v2154_v45 = vrot.slane %v4427_v43, %v4882_v21 }
 0x1af   : > { %v2162_v50 = vcombine.low %v2138_v44, %v2154_v45  ;;  %v2163_v52 = vcombine.high %v2138_v44, %v2154_v45 }
 0x1b1   : > { %v5099_v51 = vrot.slane %v2162_v50, %v4892_v40  ;;  %v2177_v59 = vrot.slane %v2163_v52, %v4892_v40 }
 0x1b2   : > { %1966 = vxpose.xlu1.b32.start.end [1/1] (short) (narrow) %v1516_v6, 8 }
 0x1b3   : > { %v2194_v60 = vcombine.high %v5099_v51, %v4662_v10  ;;  %v2195_v6 = vcombine.high %v2177_v59, %v4662_v10 }
 0x1d0   : > { %2199 = vrot.lane.b32.xlu1 %v2194_v60, %s4663_s15 }
 0x1d2   : > { %2203 = vrot.lane.b32.xlu0 %v2177_v59, %s4661_s13 }
 0x1d4   : > { %2207 = vrot.lane.b32.xlu1 %v2195_v6, %s4668_s24 }
 0x1e3   : > { %v1161_v57 = vpop.permute.xlu1 %1160 }
 0x1e5   : > { %v1157_v1 = vpop.permute.xlu0 %1156 }
 0x1e6   : > { %v1184_v55 = vsel %vm1183_vm0, %v5058_v39, %v1157_v1 }
 0x1e7   : > { %v1186_v48 = vsel %vm1185_vm1, %v1184_v55, %v1161_v57 }
 0x1f3   : > { %v1169_v61 = vpop.permute.xlu1 %1168 }
 0x1f5   : > { %v1173_v4 = vpop.permute.xlu0 %1172 }
 0x1f7   : > { %v1177_v35 = vpop.permute.xlu1 %1176 }
 0x1f9   : > { %v1181_v14 = vpop.permute.xlu0 %1180 }
 0x1fb   : > { %v1165_v9 = vpop.permute.xlu1 %1164 }
 0x1fc   : > { %v1188_v58 = vsel %vm1187_vm2, %v1186_v48, %v1165_v9 }
 0x1fd   : > { %v1190_v11 = vsel %vm1189_vm3, %v1188_v58, %v1169_v61 }
 0x1fe   : > { %v1192_v12 = vsel %vm1191_vm4, %v1190_v11, %v1173_v4 }
 0x1ff   : > { %v1194_v39 = vsel %vm1193_vm5, %v1192_v12, %v1177_v35 }
 0x200   : > { %v1196_v15 = vsel %vm1195_vm6, %v1194_v39, %v1181_v14 }
 0x201   : > { %1198 = vst.msk [vmem:[%s5117_s28] sm:$0xf] %vm1197_vm7, %v1196_v15 }
 0x225   : > { %v1950_v16 = vpop.trf.xlu0 }
 0x226   : > { %v2096_v22 = vcombine.low %v1822_v56, %v1950_v16 }
 0x228   : > { %v2103_v13 = vrot.slane %v2096_v22, %v4882_v21 }
 0x229   : > { %v2014_v18 = vpop.trf.xlu0 }
 0x22a   : > { %v2104_v20 = vcombine.low %v1886_v63, %v2014_v18 }
 0x22c   : > { %v2111_v8 = vrot.slane %v2104_v20, %v4882_v21 }
 0x22e   : > { %v2120_v25 = vcombine.low %v2103_v13, %v2111_v8 }
 0x230   : > { %v2127_v0 = vrot.slane %v2120_v25, %v4892_v40 }
 0x232   : > { %v1982_v23 = vpop.trf.xlu1 }
 0x233   : > { %v2054_v17 = vcombine.low %v1854_v54, %v1982_v23 }
 0x235   : > { %v2061_v26 = vrot.slane %v2054_v17, %v4882_v21 }
 0x237   : > { %v2070_v3 = vcombine.low %v2053_v24, %v2061_v26 }
 0x239   : > { %v2077_v49 = vrot.slane %v2070_v3, %v4892_v40 }
 0x23b   : > { %v4426_v19 = vcombine.low %v2077_v49, %v2127_v0  ;;  %v4428_v27 = vcombine.high %v2077_v49, %v2127_v0 }
 0x23d   : > { %v2145_v28 = vrot.slane %v4426_v19, %v4882_v21  ;;  %v2161_v29 = vrot.slane %v4428_v27, %v4882_v21 }
 0x23f   : > { %v2179_v30 = vcombine.high %v2145_v28, %v2161_v29  ;;  %v2178_v32 = vcombine.low %v2145_v28, %v2161_v29 }
 0x241   : > { %v2193_v31 = vrot.slane %v2179_v30, %v4892_v40  ;;  %v2186_v33 = vrot.slane %v2178_v32, %v4892_v40 }
 0x242   : > { %v2200_v47 = vpop.permute.xlu1 %2199 }
 0x243   : > { %2219 = vrot.lane.b32.xlu0 %v2193_v31, %s4666_s22  ;;  %2211 = vrot.lane.b32.xlu1 %v2186_v33, %s4664_s16  ;;  %v2196_v36 = vcombine.high %v2186_v33, %v4662_v10  ;;  %v2197_v37 = vcombine.high %v2193_v31, %v4662_v10  ;;  %v2226_v42 = vsel %vm1183_vm0, %v5099_v51, %v2200_v47 }
 0x244   : > { %v2204_v2 = vpop.permute.xlu0 %2203 }
 0x245   : > { %v2227_v43 = vsel %vm1185_vm1, %v2226_v42, %v2204_v2 }
 0x246   : > { %v2208_v5 = vpop.permute.xlu1 %2207 }
 0x247   : > { %2240 = vrot.lane.b32.xlu0 %v5134_v34, %s4653_s29  ;;  %2215 = vrot.lane.b32.xlu1 %v2196_v36, %s4665_s17  ;;  %v2228_v50 = vsel %vm1187_vm2, %v2227_v43, %v2208_v5 }
 0x24b   : > { %2246 = vrot.lane.b32.xlu0 %v5134_v34, %s4652_s27  ;;  %2223 = vrot.lane.b32.xlu1 %v2197_v37, %s4667_s23 }
 0x24f   : > { %2252 = vrot.lane.b32.xlu0 %v5134_v34, %s4654_s18  ;;  %2242 = vrot.lane.b32.xlu1 %v5145_v38, %s4653_s29 }
 0x253   : > { %2258 = vrot.lane.b32.xlu0 %v5134_v34, %s4655_s30  ;;  %2248 = vrot.lane.b32.xlu1 %v5145_v38, %s4652_s27 }
 0x257   : > { %2264 = vrot.lane.b32.xlu0 %v5134_v34, %s4656_s2  ;;  %2254 = vrot.lane.b32.xlu1 %v5145_v38, %s4654_s18 }
 0x25b   : > { %2270 = vrot.lane.b32.xlu0 %v5134_v34, %s4657_s5  ;;  %2260 = vrot.lane.b32.xlu1 %v5145_v38, %s4655_s30 }
 0x25f   : > { %2276 = vrot.lane.b32.xlu0 %v5134_v34, %s4658_s12  ;;  %2266 = vrot.lane.b32.xlu1 %v5145_v38, %s4656_s2 }
 0x263   : > { %3282 = vrot.lane.b32.xlu0 %v5168_v41, %s4652_s27  ;;  %2272 = vrot.lane.b32.xlu1 %v5145_v38, %s4657_s5 }
 0x267   : > { %3294 = vrot.lane.b32.xlu0 %v5168_v41, %s4655_s30  ;;  %3276 = vrot.lane.b32.xlu1 %v5168_v41, %s4653_s29 }
 0x26b   : > { %3306 = vrot.lane.b32.xlu0 %v5168_v41, %s4657_s5  ;;  %3288 = vrot.lane.b32.xlu1 %v5168_v41, %s4654_s18 }
 0x26f   : > { %2278 = vrot.lane.b32.xlu0 %v5145_v38, %s4658_s12  ;;  %3300 = vrot.lane.b32.xlu1 %v5168_v41, %s4656_s2 }
 0x273   : > { %3312 = vrot.lane.b32.xlu1 %v5168_v41, %s4658_s12  ;;  %3284 = vrot.lane.b32.xlu0 %v5187_v46, %s4652_s27 }
 0x277   : > { %3278 = vrot.lane.b32.xlu1 %v5187_v46, %s4653_s29  ;;  %3296 = vrot.lane.b32.xlu0 %v5187_v46, %s4655_s30  ;;  %s4565_s30 = scalar_lea.vmem %s5431_s3, 256 }
 0x278   : > { %p4566_p8 = scmp.ne.s32.totalorder %s5431_s3, %s4565_s30 }
 0x27a   : > { %p4567_p11 = pnand %p4566_p8, %p5500_p9 }
 0x27b   : > { %3290 = vrot.lane.b32.xlu1 %v5187_v46, %s4654_s18  ;;  %3308 = vrot.lane.b32.xlu0 %v5187_v46, %s4657_s5  ;;  %s5438_s18 = scalar_lea.hbm %s5492_s1, %s4451_s4 }
 0x27c   : > { %p4568_p0 = pneg %p4567_p11 }
 0x27f   : > { %3302 = vrot.lane.b32.xlu1 %v5187_v46, %s4656_s2  ;;  %s4669_s2 = smov [#allocation5]  }
 0x280   : > { %s4569_s5 = sshll.u32 %s4669_s2, 4  ;;  %s4570_s5 = int_to_ptr.vmem [resolvable:$false] %s4569_s5 }
 0x281   : > { %p4572_p6 = scmp.lt.s32.totalorder %s5431_s3, %s4570_s5 }
 0x283   : > { %3314 = vrot.lane.b32.xlu1 %v5187_v46, %s4658_s12  ;;  %s4571_s12 = scalar_lea.vmem %s4570_s5, 512 }
 0x284   : > { %p4573_p13 = scmp.lt.s32.totalorder %s4571_s12, %s4565_s30 }
 0x286   : > { %p4574_p2 = por %p4573_p13, %p4572_p6 }
 0x288   : > { %p4575_p5 = pnand %p4574_p2, %p4568_p0 }
 0x2b5   : > { %v2212_v44 = vpop.permute.xlu1 %2211  ;;  %v2220_v45 = vpop.permute.xlu0 %2219 }
 0x2b6   : > { %v2229_v52 = vsel %vm1189_vm3, %v2228_v50, %v2212_v44 }
 0x2b9   : > { %v2216_v60 = vpop.permute.xlu1 %2215  ;;  %v2241_v59 = vpop.permute.xlu0 %2240 }
 0x2ba   : > { %v2230_v6 = vsel %vm1191_vm4, %v2229_v52, %v2216_v60 }
 0x2bb   : > { %v2231_v54 = vsel %vm1193_vm5, %v2230_v6, %v2220_v45 }
 0x2bd   : > { %v2224_v53 = vpop.permute.xlu1 %2223  ;;  %v2247_v56 = vpop.permute.xlu0 %2246 }
 0x2be   : > { %v2232_v62 = vsel %vm1195_vm6, %v2231_v54, %v2224_v53  ;;  %v2282_v4 = vcombine.low %v5134_v34, %v2247_v56  ;;  %v2283_v18 = vcombine.high %v5134_v34, %v2247_v56 }
 0x2bf   : > { %4429 = vst.msk [vmem:[%s5117_s28 + $0x4] sm:$0xf] %vm1197_vm7, %v2232_v62 }
 0x2c0   : > { %v2290_v39 = vrot.slane %v2282_v4, %v4882_v21  ;;  %v2297_v3 = vrot.slane %v2283_v18, %v4882_v21 }
 0x2c1   : > { %v5215_v51 = vpop.permute.xlu1 %2242  ;;  %v2253_v63 = vpop.permute.xlu0 %2252 }
 0x2c2   : > { %v2298_v55 = vcombine.low %v2241_v59, %v2253_v63  ;;  %v2299_v58 = vcombine.high %v2241_v59, %v2253_v63 }
 0x2c4   : > { %v2306_v11 = vrot.slane %v2298_v55, %v4882_v21  ;;  %v2313_v7 = vrot.slane %v2299_v58, %v4882_v21 }
 0x2c5   : > { %v5217_v57 = vpop.permute.xlu1 %2248  ;;  %v2259_v61 = vpop.permute.xlu0 %2258 }
 0x2c6   : > { %v2346_v8 = vcombine.low %v2290_v39, %v2306_v11  ;;  %v2362_v28 = vcombine.low %v2297_v3, %v2313_v7  ;;  %v2347_v30 = vcombine.high %v2290_v39, %v2306_v11  ;;  %v2363_v47 = vcombine.high %v2297_v3, %v2313_v7 }
 0x2c7   : > { %v2418_v5 = vcombine.low %v5145_v38, %v5217_v57 }
 0x2c8   : > { %v2354_v27 = vrot.slane %v2346_v8, %v4892_v40  ;;  %v2370_v43 = vrot.slane %v2362_v28, %v4892_v40  ;;  %v2361_v50 = vrot.slane %v2347_v30, %v4892_v40  ;;  %v2377_v54 = vrot.slane %v2363_v47, %v4892_v40 }
 0x2c9   : > { %v5219_v1 = vpop.permute.xlu1 %2254  ;;  %v2265_v35 = vpop.permute.xlu0 %2264  ;;  %v2426_v6 = vrot.slane %v2418_v5, %v4882_v21 }
 0x2ca   : > { %v2434_v42 = vcombine.low %v5215_v51, %v5219_v1 }
 0x2cc   : > { %v2442_v53 = vrot.slane %v2434_v42, %v4882_v21 }
 0x2cd   : > { %v5222_v9 = vpop.permute.xlu1 %2260  ;;  %v2271_v48 = vpop.permute.xlu0 %2270 }
 0x2ce   : > { %v2314_v12 = vcombine.low %v2259_v61, %v2271_v48  ;;  %v2315_v14 = vcombine.high %v2259_v61, %v2271_v48  ;;  %v2482_v4 = vcombine.low %v2426_v6, %v2442_v53  ;;  %v2483_v7 = vcombine.high %v2426_v6, %v2442_v53 }
 0x2d0   : > { %v2322_v23 = vrot.slane %v2314_v12, %v4882_v21  ;;  %v2329_v13 = vrot.slane %v2315_v14, %v4882_v21 }
 0x2d1   : > { %v5226_v15 = vpop.permute.xlu1 %2266  ;;  %v2277_v16 = vpop.permute.xlu0 %2276 }
 0x2d2   : > { %v2330_v20 = vcombine.low %v2265_v35, %v2277_v16  ;;  %v2331_v22 = vcombine.high %v2265_v35, %v2277_v16 }
 0x2d4   : > { %v2338_v17 = vrot.slane %v2330_v20, %v4882_v21  ;;  %v2345_v24 = vrot.slane %v2331_v22, %v4882_v21 }
 0x2d5   : > { %v5234_v25 = vpop.permute.xlu1 %2272  ;;  %v5236_v26 = vpop.permute.xlu0 %3282 }
 0x2d6   : > { %v2378_v0 = vcombine.low %v2322_v23, %v2338_v17  ;;  %v2394_v49 = vcombine.low %v2329_v13, %v2345_v24  ;;  %v2379_v19 = vcombine.high %v2322_v23, %v2338_v17  ;;  %v2395_v33 = vcombine.high %v2329_v13, %v2345_v24 }
 0x2d7   : > { %v2450_v56 = vcombine.low %v5222_v9, %v5234_v25  ;;  %v3318_v39 = vcombine.low %v5168_v41, %v5236_v26  ;;  %v2490_v17 = vrot.slane %v2482_v4, %v4892_v40 }
 0x2d8   : > { %v2386_v29 = vrot.slane %v2378_v0, %v4892_v40  ;;  %v2402_v37 = vrot.slane %v2394_v49, %v4892_v40  ;;  %v2393_v2 = vrot.slane %v2379_v19, %v4892_v40  ;;  %v2409_v60 = vrot.slane %v2395_v33, %v4892_v40 }
 0x2d9   : > { %v5241_v32 = vpop.permute.xlu1 %3276  ;;  %v5243_v31 = vpop.permute.xlu0 %3294  ;;  %v2458_v48 = vrot.slane %v2450_v56, %v4882_v21  ;;  %v3326_v0 = vrot.slane %v3318_v39, %v4882_v21 }
 0x2da   : > { %v2411_v34 = vcombine.high %v2354_v27, %v2386_v29  ;;  %v2410_v36 = vcombine.low %v2354_v27, %v2386_v29  ;;  %v2415_v52 = vcombine.high %v2370_v43, %v2402_v37  ;;  %v2412_v59 = vcombine.low %v2361_v50, %v2393_v2 }
 0x2db   : > { %v2417_v61 = vcombine.high %v2377_v54, %v2409_v60  ;;  %v2413_v55 = vcombine.high %v2361_v50, %v2393_v2  ;;  %v2414_v22 = vcombine.low %v2370_v43, %v2402_v37  ;;  %v2416_v27 = vcombine.low %v2377_v54, %v2409_v60 }
 0x2dc   : > { %2586 = vxpose.xlu1.b32.start.end [1/1] (short) (narrow) %v2411_v34, 8  ;;  %2554 = vxpose.xlu0.b32.start.end [1/1] (short) (narrow) %v2410_v36, 8  ;;  %v2497_v37 = vrot.slane %v2483_v7, %v4892_v40  ;;  %v3319_v2 = vcombine.high %v5168_v41, %v5236_v26 }
 0x2dd   : > { %v3289_v44 = vpop.permute.xlu1 %3288  ;;  %v3307_v45 = vpop.permute.xlu0 %3306 }
 0x2de   : > { %v3334_v58 = vcombine.low %v5241_v32, %v3289_v44  ;;  %v3350_v11 = vcombine.low %v5243_v31, %v3307_v45  ;;  %v3335_v30 = vcombine.high %v5241_v32, %v3289_v44  ;;  %v3351_v36 = vcombine.high %v5243_v31, %v3307_v45 }
 0x2df   : > { %v3333_v60 = vrot.slane %v3319_v2, %v4882_v21 }
 0x2e0   : > { %2714 = vxpose.xlu1.b32.start.end [1/1] (short) (narrow) %v2415_v52, 8  ;;  %2618 = vxpose.xlu0.b32.start.end [1/1] (short) (narrow) %v2412_v59, 8  ;;  %v3342_v23 = vrot.slane %v3334_v58, %v4882_v21  ;;  %v3358_v13 = vrot.slane %v3350_v11, %v4882_v21  ;;  %v3349_v44 = vrot.slane %v3335_v30, %v4882_v21 }
 0x2e1   : > { %v3301_v62 = vpop.permute.xlu1 %3300  ;;  %v5259_v63 = vpop.permute.xlu0 %2278  ;;  %v3365_v31 = vrot.slane %v3351_v36, %v4882_v21 }
 0x2e2   : > { %v2466_v35 = vcombine.low %v5226_v15, %v5259_v63  ;;  %v3382_v34 = vcombine.low %v3326_v0, %v3342_v23  ;;  %v3383_v52 = vcombine.high %v3326_v0, %v3342_v23  ;;  %v2467_v41 = vcombine.high %v5226_v15, %v5259_v63 }
 0x2e4   : > { %2778 = vxpose.xlu1.b32.start.end [1/1] (short) (narrow) %v2417_v61, 8  ;;  %v2474_v12 = vrot.slane %v2466_v35, %v4882_v21  ;;  %2650 = vxpose.xlu0.b32.start.end [1/1] (short) (narrow) %v2413_v55, 8  ;;  %v3390_v45 = vrot.slane %v3382_v34, %v4892_v40  ;;  %v2435_v61 = vcombine.high %v5215_v51, %v5219_v1 }
 0x2e5   : > { %v3313_v14 = vpop.permute.xlu1 %3312  ;;  %v5279_v33 = vpop.permute.xlu0 %3284  ;;  %v2451_v35 = vcombine.high %v5222_v9, %v5234_v25  ;;  %v3398_v55 = vcombine.low %v3333_v60, %v3349_v44  ;;  %v3397_v15 = vrot.slane %v3383_v52, %v4892_v40  ;;  %v2481_v63 = vrot.slane %v2467_v41, %v4882_v21 }
 0x2e6   : > { %v3366_v16 = vcombine.low %v3301_v62, %v3313_v14  ;;  %v2514_v18 = vcombine.low %v2458_v48, %v2474_v12  ;;  %v2515_v20 = vcombine.high %v2458_v48, %v2474_v12  ;;  %v3367_v49 = vcombine.high %v3301_v62, %v3313_v14 }
 0x2e7   : > { %v2419_v62 = vcombine.high %v5145_v38, %v5217_v57  ;;  %v2449_v57 = vrot.slane %v2435_v61, %v4882_v21  ;;  %v2465_v51 = vrot.slane %v2451_v35, %v4882_v21  ;;  %v3399_v25 = vcombine.high %v3333_v60, %v3349_v44 }
 0x2e8   : > { %v3374_v8 = vrot.slane %v3366_v16, %v4882_v21  ;;  %2682 = vxpose.xlu0.b32.start.end [1/1] (short) (narrow) %v2414_v22, 8  ;;  %v2522_v24 = vrot.slane %v2514_v18, %v4892_v40  ;;  %v2529_v29 = vrot.slane %v2515_v20, %v4892_v40  ;;  %v3381_v5 = vrot.slane %v3367_v49, %v4882_v21 }
 0x2e9   : > { %v5274_v3 = vpop.permute.xlu1 %3278  ;;  %v5297_v59 = vpop.permute.xlu0 %3296  ;;  %v2433_v38 = vrot.slane %v2419_v62, %v4882_v21  ;;  %v3406_v12 = vrot.slane %v3398_v55, %v4892_v40  ;;  %v2530_v14 = vcombine.low %v2465_v51, %v2481_v63  ;;  %v3454_v16 = vcombine.low %v5187_v46, %v5279_v33 }
 0x2ea   : > { %v3414_v19 = vcombine.low %v3358_v13, %v3374_v8  ;;  %v2547_v28 = vcombine.high %v2490_v17, %v2522_v24  ;;  %v3415_v42 = vcombine.high %v3358_v13, %v3374_v8  ;;  %v2549_v43 = vcombine.high %v2497_v37, %v2529_v29 }
 0x2eb   : > { %v2546_v50 = vcombine.low %v2490_v17, %v2522_v24  ;;  %v3430_v6 = vcombine.low %v3365_v31, %v3381_v5  ;;  %v2548_v54 = vcombine.low %v2497_v37, %v2529_v29  ;;  %v3431_v4 = vcombine.high %v3365_v31, %v3381_v5 }
 0x2ec   : > { %2746 = vxpose.xlu0.b32.start.end [1/1] (short) (narrow) %v2416_v27, 8  ;;  %2842 = vxpose.xlu1.b32.start.end [1/1] (short) (narrow) %v2547_v28, 8  ;;  %v3422_v32 = vrot.slane %v3414_v19, %v4892_v40  ;;  %v3429_v56 = vrot.slane %v3415_v42, %v4892_v40  ;;  %v2498_v23 = vcombine.low %v2433_v38, %v2449_v57 }
 0x2ed   : > { %v5283_v47 = vpop.permute.xlu1 %3290  ;;  %v3438_v11 = vrot.slane %v3430_v6, %v4892_v40  ;;  %v3309_v9 = vpop.permute.xlu0 %3308  ;;  %v3445_v18 = vrot.slane %v3431_v4, %v4892_v40  ;;  %v2531_v13 = vcombine.high %v2465_v51, %v2481_v63  ;;  %v3413_v17 = vrot.slane %v3399_v25, %v4892_v40 }
 0x2ee   : > { %v3447_v53 = vcombine.high %v3390_v45, %v3422_v32  ;;  %v3449_v48 = vcombine.high %v3397_v15, %v3429_v56  ;;  %v3446_v58 = vcombine.low %v3390_v45, %v3422_v32  ;;  %v3470_v39 = vcombine.low %v5274_v3, %v5283_v47 }
 0x2ef   : > { %v3486_v22 = vcombine.low %v5297_v59, %v3309_v9  ;;  %v3451_v7 = vcombine.high %v3406_v12, %v3438_v11  ;;  %v3448_v8 = vcombine.low %v3397_v15, %v3429_v56  ;;  %v2499_v24 = vcombine.high %v2433_v38, %v2449_v57 }
 0x2f0   : > { %2906 = vxpose.xlu1.b32.start.end [1/1] (short) (narrow) %v2549_v43, 8  ;;  %2810 = vxpose.xlu0.b32.start.end [1/1] (short) (narrow) %v2546_v50, 8  ;;  %v3478_v0 = vrot.slane %v3470_v39, %v4882_v21  ;;  %v3462_v49 = vrot.slane %v3454_v16, %v4882_v21  ;;  %v2538_v19 = vrot.slane %v2530_v14, %v4892_v40 }
 0x2f1   : > { %v5295_v26 = vpop.permute.xlu1 %3302  ;;  %v3494_v28 = vrot.slane %v3486_v22, %v4882_v21  ;;  %v3453_v29 = vcombine.high %v3413_v17, %v3445_v18  ;;  %v3450_v30 = vcombine.low %v3406_v12, %v3438_v11  ;;  %v2506_v34 = vrot.slane %v2498_v23, %v4892_v40 }
 0x2f2   : > { %v3455_v36 = vcombine.high %v5187_v46, %v5279_v33  ;;  %v2545_v37 = vrot.slane %v2531_v13, %v4892_v40  ;;  %v3471_v2 = vcombine.high %v5274_v3, %v5283_v47  ;;  %v3487_v5 = vcombine.high %v5297_v59, %v3309_v9 }
 0x2f3   : > { %v2551_v42 = vcombine.high %v2506_v34, %v2538_v19  ;;  %v2513_v43 = vrot.slane %v2499_v24, %v4892_v40  ;;  %v3518_v50 = vcombine.low %v3462_v49, %v3478_v0  ;;  %v3452_v52 = vcombine.low %v3413_v17, %v3445_v18 }
 0x2f4   : > { %3622 = vxpose.xlu1.b32.start.end [1/1] (short) (narrow) %v3447_v53, 8  ;;  %2874 = vxpose.xlu0.b32.start.end [1/1] (short) (narrow) %v2548_v54, 8  ;;  %v3469_v31 = vrot.slane %v3455_v36, %v4882_v21  ;;  %v3485_v33 = vrot.slane %v3471_v2, %v4882_v21  ;;  %v3519_v45 = vcombine.high %v3462_v49, %v3478_v0 }
 0x2f5   : > { %v3315_v1 = vpop.permute.xlu1 %3314  ;;  %v2553_v46 = vcombine.high %v2513_v43, %v2545_v37  ;;  %v3501_v3 = vrot.slane %v3487_v5, %v4882_v21  ;;  %v2550_v47 = vcombine.low %v2506_v34, %v2538_v19  ;;  %v3526_v59 = vrot.slane %v3518_v50, %v4892_v40 }
 0x2f6   : > { %v3502_v20 = vcombine.low %v5295_v26, %v3315_v1  ;;  %v3503_v32 = vcombine.high %v5295_v26, %v3315_v1  ;;  %v3534_v6 = vcombine.low %v3469_v31, %v3485_v33  ;;  %v2552_v53 = vcombine.low %v2513_v43, %v2545_v37 }
 0x2f7   : > { %v3533_v62 = vrot.slane %v3519_v45, %v4892_v40  ;;  %v3535_v35 = vcombine.high %v3469_v31, %v3485_v33 }
 0x2f8   : > { %3686 = vxpose.xlu1.b32.start.end [1/1] (short) (narrow) %v3449_v48, 8  ;;  %3590 = vxpose.xlu0.b32.start.end [1/1] (short) (narrow) %v3446_v58, 8  ;;  %v3510_v27 = vrot.slane %v3502_v20, %v4882_v21  ;;  %v3517_v60 = vrot.slane %v3503_v32, %v4882_v21  ;;  %v3542_v55 = vrot.slane %v3534_v6, %v4892_v40 }
 0x2f9   : > { %v3549_v38 = vrot.slane %v3535_v35, %v4892_v40 }
 0x2fa   : > { %v3550_v44 = vcombine.low %v3494_v28, %v3510_v27  ;;  %v3551_v41 = vcombine.high %v3494_v28, %v3510_v27  ;;  %v3566_v54 = vcombine.low %v3501_v3, %v3517_v60  ;;  %v3567_v15 = vcombine.high %v3501_v3, %v3517_v60 }
 0x2fc   : > { %3750 = vxpose.xlu1.b32.start.end [1/1] (short) (narrow) %v3451_v7, 8  ;;  %3654 = vxpose.xlu0.b32.start.end [1/1] (short) (narrow) %v3448_v8, 8  ;;  %v3558_v26 = vrot.slane %v3550_v44, %v4892_v40  ;;  %v3565_v61 = vrot.slane %v3551_v41, %v4892_v40  ;;  %v3574_v48 = vrot.slane %v3566_v54, %v4892_v40 }
 0x2fd   : > { %v3581_v57 = vrot.slane %v3567_v15, %v4892_v40 }
 0x2fe   : > { %v3583_v56 = vcombine.high %v3526_v59, %v3558_v26  ;;  %v3585_v63 = vcombine.high %v3533_v62, %v3565_v61  ;;  %v3582_v4 = vcombine.low %v3526_v59, %v3558_v26  ;;  %v3587_v58 = vcombine.high %v3542_v55, %v3574_v48 }
 0x2ff   : > { %v3584_v11 = vcombine.low %v3533_v62, %v3565_v61  ;;  %v3589_v51 = vcombine.high %v3549_v38, %v3581_v57  ;;  %v3586_v1 = vcombine.low %v3542_v55, %v3574_v48  ;;  %v3588_v9 = vcombine.low %v3549_v38, %v3581_v57 }
 0x300   : > { %3814 = vxpose.xlu1.b32.start.end [1/1] (short) (narrow) %v3453_v29, 8  ;;  %3718 = vxpose.xlu0.b32.start.end [1/1] (short) (narrow) %v3450_v30, 8 }
 0x304   : > { %2970 = vxpose.xlu1.b32.start.end [1/1] (short) (narrow) %v2551_v42, 8  ;;  %3782 = vxpose.xlu0.b32.start.end [1/1] (short) (narrow) %v3452_v52, 8 }
 0x308   : > { %3034 = vxpose.xlu1.b32.start.end [1/1] (short) (narrow) %v2553_v46, 8  ;;  %2938 = vxpose.xlu0.b32.start.end [1/1] (short) (narrow) %v2550_v47, 8 }
 0x30c   : > { %3002 = vxpose.xlu0.b32.start.end [1/1] (short) (narrow) %v2552_v53, 8  ;;  %3878 = vxpose.xlu1.b32.start.end [1/1] (short) (narrow) %v3583_v56, 8 }
 0x310   : > { %3942 = vxpose.xlu1.b32.start.end [1/1] (short) (narrow) %v3585_v63, 8  ;;  %3846 = vxpose.xlu0.b32.start.end [1/1] (short) (narrow) %v3582_v4, 8 }
 0x314   : > { %4006 = vxpose.xlu1.b32.start.end [1/1] (short) (narrow) %v3587_v58, 8  ;;  %3910 = vxpose.xlu0.b32.start.end [1/1] (short) (narrow) %v3584_v11, 8 }
 0x318   : > { %4070 = vxpose.xlu1.b32.start.end [1/1] (short) (narrow) %v3589_v51, 8  ;;  %3974 = vxpose.xlu0.b32.start.end [1/1] (short) (narrow) %v3586_v1, 8 }
 0x31c   : > { %4038 = vxpose.xlu0.b32.start.end [1/1] (short) (narrow) %v3588_v9, 8 }
 0x35c   : > { %v2602_v25 = vpop.trf.xlu1  ;;  %v2570_v12 = vpop.trf.xlu0 }
 0x360   : > { %v2730_v14 = vpop.trf.xlu1  ;;  %v2634_v39 = vpop.trf.xlu0 }
 0x361   : > { %v3116_v20 = vcombine.low %v2602_v25, %v2730_v14 }
 0x363   : > { %v3123_v8 = vrot.slane %v3116_v20, %v4882_v21 }
 0x364   : > { %v2794_v16 = vpop.trf.xlu1  ;;  %v2666_v18 = vpop.trf.xlu0 }
 0x365   : > { %v3124_v22 = vcombine.low %v2666_v18, %v2794_v16 }
 0x367   : > { %v3131_v23 = vrot.slane %v3124_v22, %v4882_v21 }
 0x368   : > { %v2698_v7 = vpop.trf.xlu0 }
 0x369   : > { %v3066_v13 = vcombine.low %v2570_v12, %v2698_v7  ;;  %v3148_v49 = vcombine.low %v3123_v8, %v3131_v23 }
 0x36b   : > { %v3073_v19 = vrot.slane %v3066_v13, %v4882_v21  ;;  %v3155_v34 = vrot.slane %v3148_v49, %v4892_v40 }
 0x36c   : > { %v2858_v17 = vpop.trf.xlu1  ;;  %v2762_v24 = vpop.trf.xlu0 }
 0x36d   : > { %v3074_v0 = vcombine.low %v2634_v39, %v2762_v24 }
 0x36f   : > { %v3081_v27 = vrot.slane %v3074_v0, %v4882_v21 }
 0x370   : > { %v2922_v28 = vpop.trf.xlu1  ;;  %v2826_v29 = vpop.trf.xlu0 }
 0x371   : > { %v3098_v30 = vcombine.low %v3073_v19, %v3081_v27 }
 0x373   : > { %v3105_v36 = vrot.slane %v3098_v30, %v4892_v40 }
 0x374   : > { %v3638_v37 = vpop.trf.xlu1  ;;  %v2890_v2 = vpop.trf.xlu0 }
 0x375   : > { %v4432_v5 = vcombine.low %v3105_v36, %v3155_v34  ;;  %v4434_v42 = vcombine.high %v3105_v36, %v3155_v34 }
 0x377   : > { %v3174_v43 = vrot.slane %v4432_v5, %v4882_v21  ;;  %v3190_v50 = vrot.slane %v4434_v42, %v4882_v21 }
 0x378   : > { %v3702_v32 = vpop.trf.xlu1  ;;  %v3606_v44 = vpop.trf.xlu0 }
 0x379   : > { %v3198_v52 = vcombine.low %v3174_v43, %v3190_v50  ;;  %v3199_v31 = vcombine.high %v3174_v43, %v3190_v50 }
 0x37b   : > { %v5356_v46 = vrot.slane %v3198_v52, %v4892_v40  ;;  %v3213_v47 = vrot.slane %v3199_v31, %v4892_v40 }
 0x37c   : > { %v3766_v33 = vpop.trf.xlu1  ;;  %v3670_v45 = vpop.trf.xlu0 }
 0x37d   : > { %v3230_v3 = vcombine.high %v5356_v46, %v4662_v10  ;;  %v4152_v59 = vcombine.low %v3638_v37, %v3766_v33  ;;  %v3231_v6 = vcombine.high %v3213_v47, %v4662_v10 }
 0x37f   : > { %3235 = vrot.lane.b32.xlu0 %v3230_v3, %s4663_s15  ;;  %v4159_v61 = vrot.slane %v4152_v59, %v4882_v21 }
 0x380   : > { %v3830_v60 = vpop.trf.xlu1  ;;  %v3734_v41 = vpop.trf.xlu0 }
 0x381   : > { %v4160_v26 = vcombine.low %v3702_v32, %v3830_v60  ;;  %v4102_v54 = vcombine.low %v3606_v44, %v3734_v41 }
 0x383   : > { %v4167_v53 = vrot.slane %v4160_v26, %v4882_v21  ;;  %3243 = vrot.lane.b32.xlu0 %v3231_v6, %s4668_s24  ;;  %v4109_v15 = vrot.slane %v4102_v54, %v4882_v21 }
 0x384   : > { %v2986_v56 = vpop.trf.xlu1  ;;  %v3798_v62 = vpop.trf.xlu0 }
 0x385   : > { %v4110_v35 = vcombine.low %v3670_v45, %v3798_v62  ;;  %v4184_v55 = vcombine.low %v4159_v61, %v4167_v53  ;;  %v3132_v58 = vcombine.low %v2858_v17, %v2986_v56 }
 0x387   : > { %v4117_v63 = vrot.slane %v4110_v35, %v4882_v21  ;;  %v4191_v51 = vrot.slane %v4184_v55, %v4892_v40  ;;  %v3139_v14 = vrot.slane %v3132_v58, %v4882_v21 }
 0x388   : > { %v3050_v4 = vpop.trf.xlu1  ;;  %v2954_v48 = vpop.trf.xlu0 }
 0x389   : > { %v4134_v11 = vcombine.low %v4109_v15, %v4117_v63  ;;  %v3140_v38 = vcombine.low %v2922_v28, %v3050_v4  ;;  %v3082_v57 = vcombine.low %v2826_v29, %v2954_v48 }
 0x38b   : > { %v4141_v1 = vrot.slane %v4134_v11, %v4892_v40  ;;  %v3147_v9 = vrot.slane %v3140_v38, %v4882_v21  ;;  %v3089_v20 = vrot.slane %v3082_v57, %v4882_v21 }
 0x38c   : > { %v3894_v25 = vpop.trf.xlu1  ;;  %v3018_v12 = vpop.trf.xlu0 }
 0x38d   : > { %v4439_v39 = vcombine.low %v4141_v1, %v4191_v51  ;;  %v4441_v16 = vcombine.high %v4141_v1, %v4191_v51  ;;  %v3090_v18 = vcombine.low %v2890_v2, %v3018_v12  ;;  %v3156_v8 = vcombine.low %v3139_v14, %v3147_v9 }
 0x38f   : > { %v4210_v22 = vrot.slane %v4439_v39, %v4882_v21  ;;  %v4226_v7 = vrot.slane %v4441_v16, %v4882_v21  ;;  %v3097_v23 = vrot.slane %v3090_v18, %v4882_v21  ;;  %v3163_v49 = vrot.slane %v3156_v8, %v4892_v40 }
 0x390   : > { %v3958_v13 = vpop.trf.xlu1  ;;  %v3862_v17 = vpop.trf.xlu0 }
 0x391   : > { %v3106_v24 = vcombine.low %v3089_v20, %v3097_v23  ;;  %v4234_v0 = vcombine.low %v4210_v22, %v4226_v7  ;;  %v4235_v44 = vcombine.high %v4210_v22, %v4226_v7 }
 0x393   : > { %v3113_v19 = vrot.slane %v3106_v24, %v4892_v40  ;;  %v5379_v27 = vrot.slane %v4234_v0, %v4892_v40  ;;  %v4249_v41 = vrot.slane %v4235_v44, %v4892_v40 }
 0x394   : > { %v4022_v28 = vpop.trf.xlu1  ;;  %v3926_v29 = vpop.trf.xlu0 }
 0x395   : > { %v4433_v30 = vcombine.low %v3113_v19, %v3163_v49  ;;  %v4435_v34 = vcombine.high %v3113_v19, %v3163_v49  ;;  %v4266_v36 = vcombine.high %v5379_v27, %v4662_v10  ;;  %v4168_v43 = vcombine.low %v3894_v25, %v4022_v28 }
 0x396   : > { %v4267_v56 = vcombine.high %v4249_v41, %v4662_v10 }
 0x397   : > { %v3181_v37 = vrot.slane %v4433_v30, %v4882_v21  ;;  %v3197_v2 = vrot.slane %v4435_v34, %v4882_v21  ;;  %4271 = vrot.lane.b32.xlu1 %v4266_v36, %s4663_s15  ;;  %v4175_v3 = vrot.slane %v4168_v43, %v4882_v21 }
 0x398   : > { %v4086_v5 = vpop.trf.xlu1  ;;  %v3990_v42 = vpop.trf.xlu0 }
 0x399   : > { %v4176_v50 = vcombine.low %v3958_v13, %v4086_v5  ;;  %v3214_v32 = vcombine.low %v3181_v37, %v3197_v2  ;;  %v4118_v31 = vcombine.low %v3862_v17, %v3990_v42  ;;  %v3215_v59 = vcombine.high %v3181_v37, %v3197_v2 }
 0x39b   : > { %v4183_v52 = vrot.slane %v4176_v50, %v4882_v21  ;;  %3239 = vrot.lane.b32.xlu1 %v3213_v47, %s4661_s13  ;;  %v3222_v33 = vrot.slane %v3214_v32, %v4892_v40  ;;  %v4125_v6 = vrot.slane %v4118_v31, %v4882_v21  ;;  %v3229_v35 = vrot.slane %v3215_v59, %v4892_v40 }
 0x39c   : > { %v4054_v45 = vpop.trf.xlu0 }
 0x39d   : > { %v4126_v60 = vcombine.low %v3926_v29, %v4054_v45  ;;  %3247 = vrot.lane.b32.xlu0 %v3222_v33, %s4664_s16  ;;  %v4192_v26 = vcombine.low %v4175_v3, %v4183_v52  ;;  %v3232_v47 = vcombine.high %v3222_v33, %v4662_v10  ;;  %v3233_v48 = vcombine.high %v3229_v35, %v4662_v10 }
 0x39f   : > { %v4133_v53 = vrot.slane %v4126_v60, %v4882_v21  ;;  %4275 = vrot.lane.b32.xlu1 %v4249_v41, %s4661_s13  ;;  %v4199_v62 = vrot.slane %v4192_v26, %v4892_v40 }
 0x3a1   : > { %v4142_v54 = vcombine.low %v4125_v6, %v4133_v53  ;;  %3251 = vrot.lane.b32.xlu0 %v3232_v47, %s4665_s17 }
 0x3a3   : > { %v4149_v61 = vrot.slane %v4142_v54, %v4892_v40  ;;  %4279 = vrot.lane.b32.xlu1 %v4267_v56, %s4668_s24 }
 0x3a5   : > { %v4440_v55 = vcombine.low %v4149_v61, %v4199_v62  ;;  %v4442_v15 = vcombine.high %v4149_v61, %v4199_v62  ;;  %3255 = vrot.lane.b32.xlu0 %v3229_v35, %s4666_s22 }
 0x3a7   : > { %v4217_v63 = vrot.slane %v4440_v55, %v4882_v21  ;;  %v4233_v4 = vrot.slane %v4442_v15, %v4882_v21 }
 0x3a9   : > { %3259 = vrot.lane.b32.xlu0 %v3233_v48, %s4667_s23  ;;  %v4250_v58 = vcombine.low %v4217_v63, %v4233_v4  ;;  %v4251_v57 = vcombine.high %v4217_v63, %v4233_v4 }
 0x3ab   : > { %v4258_v11 = vrot.slane %v4250_v58, %v4892_v40  ;;  %v4265_v51 = vrot.slane %v4251_v57, %v4892_v40 }
 0x3ad   : > { %4283 = vrot.lane.b32.xlu1 %v4258_v11, %s4664_s16  ;;  %v4268_v38 = vcombine.high %v4258_v11, %v4662_v10  ;;  %v4269_v21 = vcombine.high %v4265_v51, %v4662_v10 }
 0x3b1   : > { %4287 = vrot.lane.b32.xlu1 %v4268_v38, %s4665_s17 }
 0x3b5   : > { %4291 = vrot.lane.b32.xlu1 %v4265_v51, %s4666_s22 }
 0x3b9   : > { %4295 = vrot.lane.b32.xlu1 %v4269_v21, %s4667_s23 }
 0x3f1   : > { %v3236_v1 = vpop.permute.xlu0 %3235 }
 0x3f2   : > { %v3262_v39 = vsel %vm1183_vm0, %v5356_v46, %v3236_v1 }
 0x3f5   : > { %v3244_v25 = vpop.permute.xlu0 %3243 }
 0x409   : > { %v4272_v9 = vpop.permute.xlu1 %4271 }
 0x40a   : > { %v4298_v0 = vsel %vm1183_vm0, %v5379_v27, %v4272_v9 }
 0x40d   : > { %v3240_v12 = vpop.permute.xlu1 %3239 }
 0x40e   : > { %v3263_v16 = vsel %vm1185_vm1, %v3262_v39, %v3240_v12 }
 0x40f   : > { %v3248_v14 = vpop.permute.xlu0 %3247  ;;  %v3264_v20 = vsel %vm1187_vm2, %v3263_v16, %v3244_v25 }
 0x410   : > { %v3265_v22 = vsel %vm1189_vm3, %v3264_v20, %v3248_v14 }
 0x411   : > { %v4276_v40 = vpop.permute.xlu1 %4275 }
 0x412   : > { %v4299_v49 = vsel %vm1185_vm1, %v4298_v0, %v4276_v40 }
 0x413   : > { %v3252_v18 = vpop.permute.xlu0 %3251 }
 0x414   : > { %v3266_v7 = vsel %vm1191_vm4, %v3265_v22, %v3252_v18 }
 0x415   : > { %v4280_v8 = vpop.permute.xlu1 %4279 }
 0x416   : > { %v4300_v28 = vsel %vm1187_vm2, %v4299_v49, %v4280_v8 }
 0x417   : > { %v3256_v10 = vpop.permute.xlu0 %3255 }
 0x418   : > { %v3267_v23 = vsel %vm1193_vm5, %v3266_v7, %v3256_v10 }
 0x41b   : > { %v3260_v13 = vpop.permute.xlu0 %3259 }
 0x41c   : > { %v3268_v17 = vsel %vm1195_vm6, %v3267_v23, %v3260_v13 }
 0x41d   : > { %4436 = vst.msk [vmem:[%s5117_s28 + $0x8] sm:$0xf] %vm1197_vm7, %v3268_v17 }
 0x41f   : > { %v4284_v46 = vpop.permute.xlu1 %4283 }
 0x420   : > { %v4301_v29 = vsel %vm1189_vm3, %v4300_v28, %v4284_v46 }
 0x423   : > { %v4288_v24 = vpop.permute.xlu1 %4287 }
 0x424   : > { %v4302_v30 = vsel %vm1191_vm4, %v4301_v29, %v4288_v24 }
 0x427   : > { %v4292_v19 = vpop.permute.xlu1 %4291 }
 0x428   : > { %v4303_v27 = vsel %vm1193_vm5, %v4302_v30, %v4292_v19 }
 0x42b   : > { %v4296_v34 = vpop.permute.xlu1 %4295 }
 0x42c   : > { %v4304_v36 = vsel %vm1195_vm6, %v4303_v27, %v4296_v34 }
 0x42d   : > { %4443 = vst.msk [vmem:[%s5117_s28 + $0xc] sm:$0xf] %vm1197_vm7, %v4304_v36 }
 0x42e   : > { %4578 = shalt.err (!%p4575_p5)
}
 0x42f   : > { %s4579_s13 = scalar_lea.hbm %s5438_s18, 256  ;;  %s4583_s17 = scalar_lea.hbm %s5492_s1, 512 }
 0x430   : > { %p4580_p4 = scmp.ne.s32.totalorder %s5438_s18, %s4579_s13  ;;  %p4584_p12 = scmp.lt.u32.totalorder %s5438_s18, %s5492_s1 }
 0x431   : > { %p4585_p1 = scmp.lt.u32.totalorder %s4583_s17, %s4579_s13  ;;  %p4587_p8 = scmp.lt.u32.totalorder %s4579_s13, %s5438_s18 }
 0x432   : > { %p4581_p7 = pnand %p4580_p4, %p5500_p9 }
 0x433   : > { %p4586_p3 = por %p4585_p1, %p4584_p12 }
 0x434   : > { %p4582_p10 = pneg %p4581_p7 }
 0x435   : > { %p4588_p11 = por %p4587_p8, %p4586_p3 }
 0x437   : > { %p4589_p0 = pnand %p4588_p11, %p4582_p10 }
 0x439   : > { %4592 = shalt.err (!%p4589_p0)
}
 0x43a   : > { %s4670_s24 = smov 64   ;;  %s4671_s25 = smov 4  }
 0x43b   : > { %4454 = dma.vmem_to_hbm [thread:$0]  (%p5500_p9), %s5431_s3, 256, %s5438_s18, %s4308_s9, %s4670_s24, %s4670_s24, %s4671_s25  }
 0x43c PF: > { %s4337_s28 = sand.u32 1, %s4627_s6   ;;  %p5501_p6 = scmp.ne.s32.totalorder %s5497_s21, 0 }
 0x43d   : > { %p5502_p13 = scmp.ge.s32.totalorder %s4647_s11, 2  ;;  %s4338_s4 = scalar_lea.sflag [#allocation4], %s4337_s28 }
 0x43f   : > { %p4461_p2 = pnand %p5502_p13, %p5501_p6 }
 0x441   : > { %4622 = dma.done.wait (!%p4461_p2), %s4338_s4, 256  }
 0x442   : > { %4624 = vsyncadd (!%p4461_p2), %s4338_s4, 4294967040  ;;  %s17_s11 = sadd.s32 1, %s4647_s11   ;;  %s5503_s6 = smov %s4631_s7 }
 0x443   : > { %p14_p5 = scmp.ge.s32.totalorder %s17_s11, 4   ;;  %s5504_s7 = smov %s4635_s8 }
 0x444   : > { %s5505_s8 = smov %s4738_s20  ;;  %s5506_s9 = smov %s4643_s10 }
 0x445   : > { %s5507_s10 = smov %s5509_s14  ;;  %16 = sbr.rel (!%p14_p5) target bundleno = 6 (0x6), region = 75 }
 0x44c   :  { %4343 = vsyncpa [#allocation3], 1 }
 0x44d   :  { %4345 = vsyncpa [#allocation3 + $0x1], 1 }
 0x44e   :  { %4346 = vsyncpa [#allocation4], 1 }
 0x44f   :  { %4348 = vsyncpa [#allocation4 + $0x1], 1 }

</bundles_post_ra>
